<compile_context>
chip_gen: v7x
topology: tpu7x:2x2x1
jax: 0.10.0
libtpu: 0.0.40
codegen_flags: <defaults>
</compile_context>

<pallas_src>
import functools

import jax
import jax.numpy as jnp
import numpy as np
from jax.experimental import pallas as pl
from jax.experimental.pallas import tpu as pltpu


# ------------------------------ fused forward kernel ------------------------------
def _fused_kernel(x_ref, adj_ref, slab_ref, t_ref, tlin_ref,
                  o_ref, h1_scr, emb_scr, *,
                  alpha, nh1, h1_dim, nh2, h2_dim, input_dim, n_nodes, b_blk, layout):
    N = n_nodes
    BN = b_blk * N

    def wslab(name):
        off, r, c = layout[name]                       # static python ints
        return slab_ref[pl.ds(off, r), pl.ds(0, c)]    # static ref slice -> cheap load

    x = x_ref[...]                                     # (b_blk, N, Fin)
    x2 = x.reshape(BN, input_dim)                      # flatten batch for dense matmuls

    # Hoisted adjacency compare: 1x per grid step, reused by 2 layers x nh heads.
    # Keep the where-select (not e + mask) so columns with no incoming edge still
    # yield the reference's exactly-uniform softmax.
    adj_pos = adj_ref[...] > 0.0                       # (b_blk, N, N) bool

    def attention_heads(h_all_b, wh_b, adj_b, nh, dh):
        """Per-batch multi-head GAT attention; returns the head MEAN, (N, dh)."""
        wh_t = wh_b.T                                  # one small XLU transpose / layer / batch
        acc = jnp.zeros((N, dh), jnp.float32)
        for k in range(nh):                            # unrolled: nh is tiny (2)
            hk = h_all_b[:, k * dh:(k + 1) * dh]                           # (N, dh)
            e = wh_b[:, 2 * k:2 * k + 1] + wh_t[2 * k + 1:2 * k + 2, :]    # (N, N)
            e = jnp.where(e > 0, e, alpha * e)                             # leaky_relu(alpha)
            att = jnp.where(adj_b, e, jnp.float32(-9e15))
            # torch softmax(dim=1) on (B, N, N) == axis 0 of the per-batch tile.
            att = jnp.exp(att - jnp.max(att, axis=0, keepdims=True))
            att = att * pl.reciprocal(jnp.sum(att, axis=0, keepdims=True), approx=True)
            # TODO(synk): F.dropout(attention, training=self.training) modeled as inference no-op.
            out = jnp.dot(att, hk, preferred_element_type=jnp.float32)     # (N, dh)
            out = jnp.where(out > 0, out, alpha * out)
            # F.normalize(p=2, dim=1): L2 over the node axis, via EUP rsqrt.
            ss = jnp.sum(out * out, axis=0, keepdims=True)
            out = out * jax.lax.rsqrt(jnp.maximum(ss, jnp.float32(1e-24)))
            acc = acc + out
        return acc * jnp.float32(1.0 / nh)                                 # head mean

    # ------------- ConvLayer1: batched per-head matmuls, per-batch attention -------------
    h1_all = jnp.dot(x2, wslab("w1"), preferred_element_type=jnp.float32)   # (BN, nh1*h1_dim)
    wh1 = jnp.dot(h1_all, wslab("a1"), preferred_element_type=jnp.float32)  # (BN, 2*nh1)
    b1m = wslab("b1m")                                                      # (1, h1_dim)
    for bi in range(b_blk):
        r0 = bi * N
        h1_b = attention_heads(h1_all[r0:r0 + N, :], wh1[r0:r0 + N, :],
                               adj_pos[bi], nh1, h1_dim) + b1m
        h1_b = jnp.where(h1_b > 0, h1_b, jnp.exp(jnp.minimum(h1_b, 0.0)) - 1.0)  # ELU
        h1_scr[bi] = h1_b

    # ------------- ConvLayer2 -------------------------------------------------------------
    h1_2 = h1_scr[...].reshape(BN, h1_dim)
    h2_all = jnp.dot(h1_2, wslab("w2"), preferred_element_type=jnp.float32)  # (BN, nh2*h2_dim)
    wh2 = jnp.dot(h2_all, wslab("a2"), preferred_element_type=jnp.float32)   # (BN, 2*nh2)
    b2m = wslab("b2m")
    for bi in range(b_blk):
        r0 = bi * N
        emb_scr[bi] = attention_heads(h2_all[r0:r0 + N, :], wh2[r0:r0 + N, :],
                                      adj_pos[bi], nh2, h2_dim) + b2m

    # ------------- tf_linear1/2 + time gate + Linear_cat (batched over BN rows) ----------
    embed = emb_scr[...].reshape(BN, h2_dim)
    tf1 = jnp.dot(embed, wslab("mw1"), preferred_element_type=jnp.float32) + wslab("mb1")
    tf1 = jnp.where(tf1 > 0, tf1, 0.01 * tf1)                               # leaky_relu default
    # TODO(synk): F.dropout(p=0.01) modeled as inference no-op.
    tf2 = jnp.dot(tf1, wslab("mw2"), preferred_element_type=jnp.float32) + wslab("mb2")
    tf2 = jnp.where(tf2 > 0, tf2, 0.01 * tf2)

    # Per-row diffusion time from SMEM scalars; sigmoid done vectorized (VPU/EUP).
    g0 = pl.program_id(0) * b_blk
    row = jax.lax.broadcasted_iota(jnp.int32, (BN, 1), 0)
    t_col = jnp.zeros((BN, 1), jnp.float32)
    for bi in range(b_blk):
        in_b = jnp.logical_and(row >= bi * N, row < (bi + 1) * N)
        t_col = jnp.where(in_b, t_ref[g0 + bi], t_col)
    tp = 1.0 / (1.0 + jnp.exp(-(t_col * tlin_ref[0] + tlin_ref[1])))        # (BN, 1)
    comb = (1.0 - tp) * tf2 + tp * x2

    # Linear_cat on [x, comb] without materializing the concat.
    out2 = (jnp.dot(x2, wslab("wcx"), preferred_element_type=jnp.float32)
            + jnp.dot(comb, wslab("wcc"), preferred_element_type=jnp.float32)
            + wslab("bc"))
    # Fin < 128 lanes -> masked stores; acceptable at these tiny sizes (see review).
    o_ref[...] = out2.reshape(b_blk, N, input_dim)


def _default_num_blocks(batch):
    """One grid step per TensorCore: v7x has 2 TCs/chip, v5e/v6e have 1."""
    try:
        kind = jax.devices()[0].device_kind.lower()
    except Exception:
        kind = ""
    if "v7" in kind and batch % 2 == 0:
        return 2
    return 1


def graph_attention_encode_forward(packed, x, adj, t, alpha, num_blocks=None):
    B, N, Fin = x.shape
    adj2 = jnp.squeeze(adj, -1)
    t_flat = t.reshape(B).astype(jnp.float32)
    if num_blocks is None:
        num_blocks = _default_num_blocks(B)
    if B % num_blocks != 0:
        num_blocks = 1
    b_blk = B // num_blocks

    slab, layout = packed["slab"], packed["layout"]
    nh1, h1_dim = packed["nh1"], packed["h1_dim"]
    nh2, h2_dim = packed["nh2"], packed["h2_dim"]

    kern = functools.partial(
        _fused_kernel, alpha=alpha, nh1=nh1, h1_dim=h1_dim, nh2=nh2, h2_dim=h2_dim,
        input_dim=Fin, n_nodes=N, b_blk=b_blk, layout=layout)

    return pl.pallas_call(
        kern,
        out_shape=jax.ShapeDtypeStruct((B, N, Fin), jnp.float32),
        grid=(num_blocks,),
        in_specs=[
            pl.BlockSpec((b_blk, N, Fin), lambda g: (g, 0, 0)),     # x (batch-folded block)
            pl.BlockSpec((b_blk, N, N), lambda g: (g, 0, 0)),       # adj
            pl.BlockSpec(slab.shape, lambda g: (0, 0)),             # one lane-padded weight slab
            pl.BlockSpec(memory_space=pltpu.MemorySpace.SMEM),      # t, flat (B,)
            pl.BlockSpec(memory_space=pltpu.MemorySpace.SMEM),      # [time_w, time_b], (2,)
        ],
        out_specs=pl.BlockSpec((b_blk, N, Fin), lambda g: (g, 0, 0)),
        scratch_shapes=[
            pltpu.VMEM((b_blk, N, h1_dim), jnp.float32),            # layer-1 activations
            pltpu.VMEM((b_blk, N, h2_dim), jnp.float32),            # layer-2 embeddings
        ],
        compiler_params=pltpu.CompilerParams(dimension_semantics=("parallel",)),
    )(x, adj2, slab, t_flat, packed["tlin"])


# ----------------------------- deterministic parameters ---------------------------
def init_params(key, input_dim, hidden1, hidden2, hidden3, num_head1, num_head2):
    def xavier(k, shape, gain=1.414):
        bound = gain * float(np.sqrt(6.0 / (shape[0] + shape[1])))
        return jax.random.uniform(k, shape, jnp.float32, -bound, bound)

    def linear(k, fan_in, fan_out):
        kw, kb = jax.random.split(k)
        bound = 1.0 / float(np.sqrt(fan_in))
        wgt = jax.random.uniform(kw, (fan_in, fan_out), jnp.float32, -bound, bound)
        bia = jax.random.uniform(kb, (1, fan_out), jnp.float32, -bound, bound)
        return wgt, bia

    ks = jax.random.split(key, num_head1 + num_head2 + 4)
    params = {"layer1": [], "layer2": []}
    for i in range(num_head1):
        kw, ka = jax.random.split(ks[i])
        w = xavier(kw, (input_dim, hidden1))
        a_full = xavier(ka, (2 * hidden1, 1))
        a = jnp.concatenate([a_full[:hidden1], a_full[hidden1:]], axis=1)   # (hidden1, 2)
        b = jnp.zeros((1, hidden1), jnp.float32)
        params["layer1"].append((w, a, b))
    for i in range(num_head2):
        kw, ka = jax.random.split(ks[num_head1 + i])
        w = xavier(kw, (hidden1, hidden2))
        a_full = xavier(ka, (2 * hidden2, 1))
        a = jnp.concatenate([a_full[:hidden2], a_full[hidden2:]], axis=1)   # (hidden2, 2)
        b = jnp.zeros((1, hidden2), jnp.float32)
        params["layer2"].append((w, a, b))
    params["w1"], params["b1"] = linear(ks[-4], hidden2, hidden3)
    params["w2"], params["b2"] = linear(ks[-3], hidden3, input_dim)
    tw, tb = linear(ks[-2], 1, 1)
    params["time_w"] = tw[0, 0]
    params["time_b"] = tb[0, 0]
    params["wc"], params["bc"] = linear(ks[-1], 2 * input_dim, input_dim)
    return params
    # NOTE: weight_interact and PredefinedNoiseScheduleDiscrete are unused in forward().


def pack_params(params, num_head1, hidden1, num_head2, hidden2):
    """Concatenate per-head weights and pack every weight/bias into ONE lane-padded slab."""
    def block_diag(mats):
        rows = sum(m.shape[0] for m in mats)
        cols = sum(m.shape[1] for m in mats)
        out = jnp.zeros((rows, cols), jnp.float32)
        r = c = 0
        for m in mats:
            out = out.at[r:r + m.shape[0], c:c + m.shape[1]].set(m)
            r += m.shape[0]
            c += m.shape[1]
        return out

    input_dim = params["wc"].shape[1]
    w1_all = jnp.concatenate([w for (w, a, b) in params["layer1"]], axis=1)
    a1_bd = block_diag([a for (w, a, b) in params["layer1"]])
    b1_mean = jnp.mean(jnp.stack([b for (w, a, b) in params["layer1"]]), axis=0)  # pre-averaged bias
    w2_all = jnp.concatenate([w for (w, a, b) in params["layer2"]], axis=1)
    a2_bd = block_diag([a for (w, a, b) in params["layer2"]])
    b2_mean = jnp.mean(jnp.stack([b for (w, a, b) in params["layer2"]]), axis=0)

    entries = {
        "w1": w1_all, "a1": a1_bd, "b1m": b1_mean,
        "w2": w2_all, "a2": a2_bd, "b2m": b2_mean,
        "mw1": params["w1"], "mb1": params["b1"],
        "mw2": params["w2"], "mb2": params["b2"],
        "wcx": params["wc"][:input_dim, :],   # Linear_cat, x half
        "wcc": params["wc"][input_dim:, :],   # Linear_cat, combined-embed half
        "bc": params["bc"],
    }
    max_w = max(int(a.shape[1]) for a in entries.values())
    slab_w = ((max_w + 127) // 128) * 128            # lane-dense last dim
    layout, pieces, off = {}, [], 0
    for name, arr in entries.items():
        r, c = int(arr.shape[0]), int(arr.shape[1])
        r_pad = ((r + 7) // 8) * 8                   # sublane-aligned row offsets
        layout[name] = (off, r, c)
        pieces.append(jnp.zeros((r_pad, slab_w), jnp.float32).at[:r, :c].set(arr))
        off += r_pad
    slab = jnp.concatenate(pieces, axis=0)

    return {
        "slab": slab, "layout": layout,
        "tlin": jnp.stack([params["time_w"], params["time_b"]]).astype(jnp.float32),  # (2,)
        "nh1": num_head1, "h1_dim": hidden1,
        "nh2": num_head2, "h2_dim": hidden2,
    }


# ------------------------------ pure-JAX reference --------------------------------
def _ref_attention(x, adj2, w, a, b, alpha):
    hp = jax.lax.Precision.HIGHEST
    h = jnp.einsum("bnf,fd->bnd", x, w, precision=hp)
    wh = jnp.einsum("bnd,dk->bnk", h, a, precision=hp)
    e = wh[..., 0:1] + jnp.transpose(wh[..., 1:2], (0, 2, 1))
    e = jnp.where(e > 0, e, alpha * e)
    att = jnp.where(adj2 > 0, e, -9e15)
    att = jax.nn.softmax(att, axis=1)
    out = jnp.einsum("bij,bjd->bid", att, h, precision=hp)
    out = jnp.where(out > 0, out, alpha * out)
    norm = jnp.sqrt(jnp.sum(out * out, axis=1, keepdims=True))
    out = out / jnp.maximum(norm, 1e-12)
    return out + b


def _ref_forward(params, x, adj, t, alpha):
    hp = jax.lax.Precision.HIGHEST
    adj2 = jnp.squeeze(adj, -1)
    h1 = jnp.mean(jnp.stack([_ref_attention(x, adj2, w, a, b, alpha)
                             for (w, a, b) in params["layer1"]]), axis=0)
    h1 = jax.nn.elu(h1)
    embed = jnp.mean(jnp.stack([_ref_attention(h1, adj2, w, a, b, alpha)
                                for (w, a, b) in params["layer2"]]), axis=0)
    tf1 = jnp.einsum("bnh,ho->bno", embed, params["w1"], precision=hp) + params["b1"]
    tf1 = jnp.where(tf1 > 0, tf1, 0.01 * tf1)
    tf2 = jnp.einsum("bnh,ho->bno", tf1, params["w2"], precision=hp) + params["b2"]
    tf2 = jnp.where(tf2 > 0, tf2, 0.01 * tf2)
    t_para = jax.nn.sigmoid(t * params["time_w"] + params["time_b"])[:, :, None]
    comb = (1.0 - t_para) * tf2 + t_para * x
    cat = jnp.concatenate([x, comb], axis=-1)
    return jnp.einsum("bnh,ho->bno", cat, params["wc"], precision=hp) + params["bc"]


# ------------------------------------- main ----------------------------------------
if __name__ == "__main__":
    B, N = 2, 8
    input_dim, hidden1, hidden2, hidden3 = 16, 32, 32, 16
    num_head1, num_head2, alpha = 2, 2, 0.2

    root = jax.random.PRNGKey(0)
    kp, kx, ka, kt = jax.random.split(root, 4)
    params = init_params(kp, input_dim, hidden1, hidden2, hidden3, num_head1, num_head2)
    packed = pack_params(params, num_head1, hidden1, num_head2, hidden2)

    x = jax.random.normal(kx, (B, N, input_dim), jnp.float32)
    adj = (jax.random.uniform(ka, (B, N, N, 1)) > 0.5).astype(jnp.float32)
    t = jax.random.uniform(kt, (B, 1), jnp.float32)

    out = graph_attention_encode_forward(packed, x, adj, t, alpha)
    out = jax.block_until_ready(out)

    ref = _ref_forward(params, x, adj, t, alpha)
    # Tolerance: kernel uses default (bf16-pass) MXU precision and an approximate EUP
    # reciprocal for the softmax denominator; the reference runs at Precision.HIGHEST.
    np.testing.assert_allclose(np.asarray(out), np.asarray(ref), rtol=2e-3, atol=2e-3)

    print("KERNEL_OK")
</pallas_src>

<mosaic_0001>
module attributes {stable_mosaic.version = 11 : i64} {
  func.func @_fused_kernel(%arg0: i32, %arg1: memref<2x8x16xf32, #tpu.memory_space<vmem>>, %arg2: memref<2x8x8xf32, #tpu.memory_space<vmem>>, %arg3: memref<296x128xf32, #tpu.memory_space<vmem>>, %arg4: memref<2xf32, #tpu.memory_space<smem>>, %arg5: memref<2xf32, #tpu.memory_space<smem>>, %arg6: memref<2x8x16xf32, #tpu.memory_space<vmem>>, %arg7: memref<2x8x32xf32, #tpu.memory_space<vmem>>, %arg8: memref<2x8x32xf32, #tpu.memory_space<vmem>>) attributes {dimension_semantics = [#tpu.dimension_semantics<parallel>], iteration_bounds = array<i64: 1>, scalar_prefetch = 0 : i64, scratch_operands = 2 : i64, tpu.core_type = #tpu.core_type<tc>, window_params = [{transform_indices = @transform_0, window_bounds = array<i64: 2, 8, 16>}, {transform_indices = @transform_1, window_bounds = array<i64: 2, 8, 8>}, {pipeline_mode = #tpu.pipeline_mode<synchronous>, transform_indices = @transform_2, window_bounds = array<i64: 296, 128>}, {transform_indices = @transform_3, window_bounds = array<i64: 2>}, {transform_indices = @transform_4, window_bounds = array<i64: 2>}, {transform_indices = @transform_5, window_bounds = array<i64: 2, 8, 16>}]} {
    %c0 = arith.constant 0 : index
    %c0_0 = arith.constant 0 : index
    %c0_1 = arith.constant 0 : index
    %0 = vector.load %arg1[%c0, %c0_0, %c0_1] : memref<2x8x16xf32, #tpu.memory_space<vmem>>, vector<2x8x16xf32>
    %1 = vector.shape_cast %0 : vector<2x8x16xf32> to vector<16x16xf32>
    %c0_2 = arith.constant 0 : index
    %c0_3 = arith.constant 0 : index
    %c0_4 = arith.constant 0 : index
    %2 = vector.load %arg2[%c0_2, %c0_3, %c0_4] : memref<2x8x8xf32, #tpu.memory_space<vmem>>, vector<2x8x8xf32>
    %cst = arith.constant 0.000000e+00 : f32
    %3 = vector.broadcast %cst : f32 to vector<2x8x8xf32>
    %4 = arith.cmpf ogt, %2, %3 : vector<2x8x8xf32>
    %c0_5 = arith.constant 0 : index
    %c0_6 = arith.constant 0 : index
    %5 = vector.load %arg3[%c0_5, %c0_6] : memref<296x128xf32, #tpu.memory_space<vmem>>, vector<16x64xf32>
    %cst_7 = arith.constant dense<0.000000e+00> : vector<16x64xf32>
    %6 = tpu.matmul %1, %5, %cst_7 {dimension_numbers = #tpu.dot_dimension_numbers<[1], [0], [0], [1], [0, 0, 1, 1], [], []>} : vector<16x16xf32>, vector<16x64xf32>, vector<16x64xf32> -> vector<16x64xf32>
    %c16 = arith.constant 16 : index
    %c0_8 = arith.constant 0 : index
    %7 = vector.load %arg3[%c16, %c0_8] : memref<296x128xf32, #tpu.memory_space<vmem>>, vector<64x4xf32>
    %cst_9 = arith.constant dense<0.000000e+00> : vector<16x4xf32>
    %8 = tpu.matmul %6, %7, %cst_9 {dimension_numbers = #tpu.dot_dimension_numbers<[1], [0], [0], [1], [0, 0, 1, 1], [], []>} : vector<16x64xf32>, vector<64x4xf32>, vector<16x4xf32> -> vector<16x4xf32>
    %c80 = arith.constant 80 : index
    %c0_10 = arith.constant 0 : index
    %9 = vector.load %arg3[%c80, %c0_10] : memref<296x128xf32, #tpu.memory_space<vmem>>, vector<1x32xf32>
    %10 = vector.extract_strided_slice %6 {offsets = [0, 0], sizes = [8, 64], strides = [1, 1]} : vector<16x64xf32> to vector<8x64xf32>
    %11 = vector.extract_strided_slice %8 {offsets = [0, 0], sizes = [8, 4], strides = [1, 1]} : vector<16x4xf32> to vector<8x4xf32>
    %12 = vector.extract_strided_slice %4 {offsets = [0, 0, 0], sizes = [1, 8, 8], strides = [1, 1, 1]} : vector<2x8x8xi1> to vector<1x8x8xi1>
    %13 = vector.shape_cast %12 : vector<1x8x8xi1> to vector<8x8xi1>
    %14 = tpu.transpose %11, [1, 0] : vector<8x4xf32> -> vector<4x8xf32>
    %cst_11 = arith.constant 0.000000e+00 : f32
    %15 = vector.broadcast %cst_11 : f32 to vector<8x32xf32>
    %16 = vector.extract_strided_slice %10 {offsets = [0, 0], sizes = [8, 32], strides = [1, 1]} : vector<8x64xf32> to vector<8x32xf32>
    %17 = vector.extract_strided_slice %11 {offsets = [0, 0], sizes = [8, 1], strides = [1, 1]} : vector<8x4xf32> to vector<8x1xf32>
    %18 = vector.extract_strided_slice %14 {offsets = [1, 0], sizes = [1, 8], strides = [1, 1]} : vector<4x8xf32> to vector<1x8xf32>
    %19 = vector.broadcast %17 : vector<8x1xf32> to vector<8x8xf32>
    %20 = vector.broadcast %18 : vector<1x8xf32> to vector<8x8xf32>
    %21 = arith.addf %19, %20 : vector<8x8xf32>
    %cst_12 = arith.constant 0.000000e+00 : f32
    %22 = vector.broadcast %cst_12 : f32 to vector<8x8xf32>
    %23 = arith.cmpf ogt, %21, %22 : vector<8x8xf32>
    %cst_13 = arith.constant 2.000000e-01 : f32
    %24 = vector.broadcast %cst_13 : f32 to vector<8x8xf32>
    %25 = arith.mulf %24, %21 : vector<8x8xf32>
    %26 = arith.select %23, %21, %25 : vector<8x8xi1>, vector<8x8xf32>
    %cst_14 = arith.constant -9.000000e+15 : f32
    %27 = vector.broadcast %cst_14 : f32 to vector<8x8xf32>
    %28 = arith.select %13, %26, %27 : vector<8x8xi1>, vector<8x8xf32>
    %cst_15 = arith.constant dense<0xFF800000> : vector<8xf32>
    %29 = vector.multi_reduction <maximumf>, %28, %cst_15 [0] : vector<8x8xf32> to vector<8xf32>
    %30 = vector.shape_cast %29 : vector<8xf32> to vector<1x8xf32>
    %31 = vector.broadcast %30 : vector<1x8xf32> to vector<8x8xf32>
    %32 = arith.subf %28, %31 : vector<8x8xf32>
    %33 = math.exp %32 : vector<8x8xf32>
    %cst_16 = arith.constant dense<0.000000e+00> : vector<8xf32>
    %34 = vector.multi_reduction <add>, %33, %cst_16 [0] : vector<8x8xf32> to vector<8xf32>
    %35 = vector.shape_cast %34 : vector<8xf32> to vector<1x8xf32>
    %36 = tpu.reciprocal %35 {approx = true} : vector<1x8xf32> -> vector<1x8xf32>
    %37 = vector.broadcast %36 : vector<1x8xf32> to vector<8x8xf32>
    %38 = arith.mulf %33, %37 : vector<8x8xf32>
    %cst_17 = arith.constant dense<0.000000e+00> : vector<8x32xf32>
    %39 = tpu.matmul %38, %16, %cst_17 {dimension_numbers = #tpu.dot_dimension_numbers<[1], [0], [0], [1], [0, 0, 1, 1], [], []>} : vector<8x8xf32>, vector<8x32xf32>, vector<8x32xf32> -> vector<8x32xf32>
    %cst_18 = arith.constant 0.000000e+00 : f32
    %40 = vector.broadcast %cst_18 : f32 to vector<8x32xf32>
    %41 = arith.cmpf ogt, %39, %40 : vector<8x32xf32>
    %cst_19 = arith.constant 2.000000e-01 : f32
    %42 = vector.broadcast %cst_19 : f32 to vector<8x32xf32>
    %43 = arith.mulf %42, %39 : vector<8x32xf32>
    %44 = arith.select %41, %39, %43 : vector<8x32xi1>, vector<8x32xf32>
    %45 = arith.mulf %44, %44 : vector<8x32xf32>
    %cst_20 = arith.constant dense<0.000000e+00> : vector<32xf32>
    %46 = vector.multi_reduction <add>, %45, %cst_20 [0] : vector<8x32xf32> to vector<32xf32>
    %47 = vector.shape_cast %46 : vector<32xf32> to vector<1x32xf32>
    %cst_21 = arith.constant 1.000000e-24 : f32
    %48 = vector.broadcast %cst_21 : f32 to vector<1x32xf32>
    %49 = arith.maximumf %47, %48 : vector<1x32xf32>
    %50 = math.rsqrt %49 : vector<1x32xf32>
    %51 = vector.broadcast %50 : vector<1x32xf32> to vector<8x32xf32>
    %52 = arith.mulf %44, %51 : vector<8x32xf32>
    %53 = arith.addf %15, %52 : vector<8x32xf32>
    %54 = vector.extract_strided_slice %10 {offsets = [0, 32], sizes = [8, 32], strides = [1, 1]} : vector<8x64xf32> to vector<8x32xf32>
    %55 = vector.extract_strided_slice %11 {offsets = [0, 2], sizes = [8, 1], strides = [1, 1]} : vector<8x4xf32> to vector<8x1xf32>
    %56 = vector.extract_strided_slice %14 {offsets = [3, 0], sizes = [1, 8], strides = [1, 1]} : vector<4x8xf32> to vector<1x8xf32>
    %57 = vector.broadcast %55 : vector<8x1xf32> to vector<8x8xf32>
    %58 = vector.broadcast %56 : vector<1x8xf32> to vector<8x8xf32>
    %59 = arith.addf %57, %58 : vector<8x8xf32>
    %cst_22 = arith.constant 0.000000e+00 : f32
    %60 = vector.broadcast %cst_22 : f32 to vector<8x8xf32>
    %61 = arith.cmpf ogt, %59, %60 : vector<8x8xf32>
    %cst_23 = arith.constant 2.000000e-01 : f32
    %62 = vector.broadcast %cst_23 : f32 to vector<8x8xf32>
    %63 = arith.mulf %62, %59 : vector<8x8xf32>
    %64 = arith.select %61, %59, %63 : vector<8x8xi1>, vector<8x8xf32>
    %cst_24 = arith.constant -9.000000e+15 : f32
    %65 = vector.broadcast %cst_24 : f32 to vector<8x8xf32>
    %66 = arith.select %13, %64, %65 : vector<8x8xi1>, vector<8x8xf32>
    %cst_25 = arith.constant dense<0xFF800000> : vector<8xf32>
    %67 = vector.multi_reduction <maximumf>, %66, %cst_25 [0] : vector<8x8xf32> to vector<8xf32>
    %68 = vector.shape_cast %67 : vector<8xf32> to vector<1x8xf32>
    %69 = vector.broadcast %68 : vector<1x8xf32> to vector<8x8xf32>
    %70 = arith.subf %66, %69 : vector<8x8xf32>
    %71 = math.exp %70 : vector<8x8xf32>
    %cst_26 = arith.constant dense<0.000000e+00> : vector<8xf32>
    %72 = vector.multi_reduction <add>, %71, %cst_26 [0] : vector<8x8xf32> to vector<8xf32>
    %73 = vector.shape_cast %72 : vector<8xf32> to vector<1x8xf32>
    %74 = tpu.reciprocal %73 {approx = true} : vector<1x8xf32> -> vector<1x8xf32>
    %75 = vector.broadcast %74 : vector<1x8xf32> to vector<8x8xf32>
    %76 = arith.mulf %71, %75 : vector<8x8xf32>
    %cst_27 = arith.constant dense<0.000000e+00> : vector<8x32xf32>
    %77 = tpu.matmul %76, %54, %cst_27 {dimension_numbers = #tpu.dot_dimension_numbers<[1], [0], [0], [1], [0, 0, 1, 1], [], []>} : vector<8x8xf32>, vector<8x32xf32>, vector<8x32xf32> -> vector<8x32xf32>
    %cst_28 = arith.constant 0.000000e+00 : f32
    %78 = vector.broadcast %cst_28 : f32 to vector<8x32xf32>
    %79 = arith.cmpf ogt, %77, %78 : vector<8x32xf32>
    %cst_29 = arith.constant 2.000000e-01 : f32
    %80 = vector.broadcast %cst_29 : f32 to vector<8x32xf32>
    %81 = arith.mulf %80, %77 : vector<8x32xf32>
    %82 = arith.select %79, %77, %81 : vector<8x32xi1>, vector<8x32xf32>
    %83 = arith.mulf %82, %82 : vector<8x32xf32>
    %cst_30 = arith.constant dense<0.000000e+00> : vector<32xf32>
    %84 = vector.multi_reduction <add>, %83, %cst_30 [0] : vector<8x32xf32> to vector<32xf32>
    %85 = vector.shape_cast %84 : vector<32xf32> to vector<1x32xf32>
    %cst_31 = arith.constant 1.000000e-24 : f32
    %86 = vector.broadcast %cst_31 : f32 to vector<1x32xf32>
    %87 = arith.maximumf %85, %86 : vector<1x32xf32>
    %88 = math.rsqrt %87 : vector<1x32xf32>
    %89 = vector.broadcast %88 : vector<1x32xf32> to vector<8x32xf32>
    %90 = arith.mulf %82, %89 : vector<8x32xf32>
    %91 = arith.addf %53, %90 : vector<8x32xf32>
    %cst_32 = arith.constant 5.000000e-01 : f32
    %92 = vector.broadcast %cst_32 : f32 to vector<8x32xf32>
    %93 = arith.mulf %91, %92 : vector<8x32xf32>
    %94 = vector.broadcast %9 : vector<1x32xf32> to vector<8x32xf32>
    %95 = arith.addf %93, %94 : vector<8x32xf32>
    %cst_33 = arith.constant 0.000000e+00 : f32
    %96 = vector.broadcast %cst_33 : f32 to vector<8x32xf32>
    %97 = arith.cmpf ogt, %95, %96 : vector<8x32xf32>
    %cst_34 = arith.constant 0.000000e+00 : f32
    %98 = vector.broadcast %cst_34 : f32 to vector<8x32xf32>
    %99 = arith.minimumf %95, %98 : vector<8x32xf32>
    %100 = math.exp %99 : vector<8x32xf32>
    %cst_35 = arith.constant 1.000000e+00 : f32
    %101 = vector.broadcast %cst_35 : f32 to vector<8x32xf32>
    %102 = arith.subf %100, %101 : vector<8x32xf32>
    %103 = arith.select %97, %95, %102 : vector<8x32xi1>, vector<8x32xf32>
    %c0_36 = arith.constant 0 : index
    %c0_37 = arith.constant 0 : index
    %c0_38 = arith.constant 0 : index
    %104 = vector.load %arg7[%c0_36, %c0_37, %c0_38] : memref<2x8x32xf32, #tpu.memory_space<vmem>>, vector<1x8x32xf32>
    %105 = vector.shape_cast %104 : vector<1x8x32xf32> to vector<8x32xf32>
    %106 = vector.shape_cast %103 : vector<8x32xf32> to vector<1x8x32xf32>
    tpu.vector_store %arg7[%c0_36, %c0_37, %c0_38], %106 {strides = array<i32>} : memref<2x8x32xf32, #tpu.memory_space<vmem>>, vector<1x8x32xf32>,
    %107 = vector.extract_strided_slice %6 {offsets = [8, 0], sizes = [8, 64], strides = [1, 1]} : vector<16x64xf32> to vector<8x64xf32>
    %108 = vector.extract_strided_slice %8 {offsets = [8, 0], sizes = [8, 4], strides = [1, 1]} : vector<16x4xf32> to vector<8x4xf32>
    %109 = vector.extract_strided_slice %4 {offsets = [1, 0, 0], sizes = [1, 8, 8], strides = [1, 1, 1]} : vector<2x8x8xi1> to vector<1x8x8xi1>
    %110 = vector.shape_cast %109 : vector<1x8x8xi1> to vector<8x8xi1>
    %111 = tpu.transpose %108, [1, 0] : vector<8x4xf32> -> vector<4x8xf32>
    %cst_39 = arith.constant 0.000000e+00 : f32
    %112 = vector.broadcast %cst_39 : f32 to vector<8x32xf32>
    %113 = vector.extract_strided_slice %107 {offsets = [0, 0], sizes = [8, 32], strides = [1, 1]} : vector<8x64xf32> to vector<8x32xf32>
    %114 = vector.extract_strided_slice %108 {offsets = [0, 0], sizes = [8, 1], strides = [1, 1]} : vector<8x4xf32> to vector<8x1xf32>
    %115 = vector.extract_strided_slice %111 {offsets = [1, 0], sizes = [1, 8], strides = [1, 1]} : vector<4x8xf32> to vector<1x8xf32>
    %116 = vector.broadcast %114 : vector<8x1xf32> to vector<8x8xf32>
    %117 = vector.broadcast %115 : vector<1x8xf32> to vector<8x8xf32>
    %118 = arith.addf %116, %117 : vector<8x8xf32>
    %cst_40 = arith.constant 0.000000e+00 : f32
    %119 = vector.broadcast %cst_40 : f32 to vector<8x8xf32>
    %120 = arith.cmpf ogt, %118, %119 : vector<8x8xf32>
    %cst_41 = arith.constant 2.000000e-01 : f32
    %121 = vector.broadcast %cst_41 : f32 to vector<8x8xf32>
    %122 = arith.mulf %121, %118 : vector<8x8xf32>
    %123 = arith.select %120, %118, %122 : vector<8x8xi1>, vector<8x8xf32>
    %cst_42 = arith.constant -9.000000e+15 : f32
    %124 = vector.broadcast %cst_42 : f32 to vector<8x8xf32>
    %125 = arith.select %110, %123, %124 : vector<8x8xi1>, vector<8x8xf32>
    %cst_43 = arith.constant dense<0xFF800000> : vector<8xf32>
    %126 = vector.multi_reduction <maximumf>, %125, %cst_43 [0] : vector<8x8xf32> to vector<8xf32>
    %127 = vector.shape_cast %126 : vector<8xf32> to vector<1x8xf32>
    %128 = vector.broadcast %127 : vector<1x8xf32> to vector<8x8xf32>
    %129 = arith.subf %125, %128 : vector<8x8xf32>
    %130 = math.exp %129 : vector<8x8xf32>
    %cst_44 = arith.constant dense<0.000000e+00> : vector<8xf32>
    %131 = vector.multi_reduction <add>, %130, %cst_44 [0] : vector<8x8xf32> to vector<8xf32>
    %132 = vector.shape_cast %131 : vector<8xf32> to vector<1x8xf32>
    %133 = tpu.reciprocal %132 {approx = true} : vector<1x8xf32> -> vector<1x8xf32>
    %134 = vector.broadcast %133 : vector<1x8xf32> to vector<8x8xf32>
    %135 = arith.mulf %130, %134 : vector<8x8xf32>
    %cst_45 = arith.constant dense<0.000000e+00> : vector<8x32xf32>
    %136 = tpu.matmul %135, %113, %cst_45 {dimension_numbers = #tpu.dot_dimension_numbers<[1], [0], [0], [1], [0, 0, 1, 1], [], []>} : vector<8x8xf32>, vector<8x32xf32>, vector<8x32xf32> -> vector<8x32xf32>
    %cst_46 = arith.constant 0.000000e+00 : f32
    %137 = vector.broadcast %cst_46 : f32 to vector<8x32xf32>
    %138 = arith.cmpf ogt, %136, %137 : vector<8x32xf32>
    %cst_47 = arith.constant 2.000000e-01 : f32
    %139 = vector.broadcast %cst_47 : f32 to vector<8x32xf32>
    %140 = arith.mulf %139, %136 : vector<8x32xf32>
    %141 = arith.select %138, %136, %140 : vector<8x32xi1>, vector<8x32xf32>
    %142 = arith.mulf %141, %141 : vector<8x32xf32>
    %cst_48 = arith.constant dense<0.000000e+00> : vector<32xf32>
    %143 = vector.multi_reduction <add>, %142, %cst_48 [0] : vector<8x32xf32> to vector<32xf32>
    %144 = vector.shape_cast %143 : vector<32xf32> to vector<1x32xf32>
    %cst_49 = arith.constant 1.000000e-24 : f32
    %145 = vector.broadcast %cst_49 : f32 to vector<1x32xf32>
    %146 = arith.maximumf %144, %145 : vector<1x32xf32>
    %147 = math.rsqrt %146 : vector<1x32xf32>
    %148 = vector.broadcast %147 : vector<1x32xf32> to vector<8x32xf32>
    %149 = arith.mulf %141, %148 : vector<8x32xf32>
    %150 = arith.addf %112, %149 : vector<8x32xf32>
    %151 = vector.extract_strided_slice %107 {offsets = [0, 32], sizes = [8, 32], strides = [1, 1]} : vector<8x64xf32> to vector<8x32xf32>
    %152 = vector.extract_strided_slice %108 {offsets = [0, 2], sizes = [8, 1], strides = [1, 1]} : vector<8x4xf32> to vector<8x1xf32>
    %153 = vector.extract_strided_slice %111 {offsets = [3, 0], sizes = [1, 8], strides = [1, 1]} : vector<4x8xf32> to vector<1x8xf32>
    %154 = vector.broadcast %152 : vector<8x1xf32> to vector<8x8xf32>
    %155 = vector.broadcast %153 : vector<1x8xf32> to vector<8x8xf32>
    %156 = arith.addf %154, %155 : vector<8x8xf32>
    %cst_50 = arith.constant 0.000000e+00 : f32
    %157 = vector.broadcast %cst_50 : f32 to vector<8x8xf32>
    %158 = arith.cmpf ogt, %156, %157 : vector<8x8xf32>
    %cst_51 = arith.constant 2.000000e-01 : f32
    %159 = vector.broadcast %cst_51 : f32 to vector<8x8xf32>
    %160 = arith.mulf %159, %156 : vector<8x8xf32>
    %161 = arith.select %158, %156, %160 : vector<8x8xi1>, vector<8x8xf32>
    %cst_52 = arith.constant -9.000000e+15 : f32
    %162 = vector.broadcast %cst_52 : f32 to vector<8x8xf32>
    %163 = arith.select %110, %161, %162 : vector<8x8xi1>, vector<8x8xf32>
    %cst_53 = arith.constant dense<0xFF800000> : vector<8xf32>
    %164 = vector.multi_reduction <maximumf>, %163, %cst_53 [0] : vector<8x8xf32> to vector<8xf32>
    %165 = vector.shape_cast %164 : vector<8xf32> to vector<1x8xf32>
    %166 = vector.broadcast %165 : vector<1x8xf32> to vector<8x8xf32>
    %167 = arith.subf %163, %166 : vector<8x8xf32>
    %168 = math.exp %167 : vector<8x8xf32>
    %cst_54 = arith.constant dense<0.000000e+00> : vector<8xf32>
    %169 = vector.multi_reduction <add>, %168, %cst_54 [0] : vector<8x8xf32> to vector<8xf32>
    %170 = vector.shape_cast %169 : vector<8xf32> to vector<1x8xf32>
    %171 = tpu.reciprocal %170 {approx = true} : vector<1x8xf32> -> vector<1x8xf32>
    %172 = vector.broadcast %171 : vector<1x8xf32> to vector<8x8xf32>
    %173 = arith.mulf %168, %172 : vector<8x8xf32>
    %cst_55 = arith.constant dense<0.000000e+00> : vector<8x32xf32>
    %174 = tpu.matmul %173, %151, %cst_55 {dimension_numbers = #tpu.dot_dimension_numbers<[1], [0], [0], [1], [0, 0, 1, 1], [], []>} : vector<8x8xf32>, vector<8x32xf32>, vector<8x32xf32> -> vector<8x32xf32>
    %cst_56 = arith.constant 0.000000e+00 : f32
    %175 = vector.broadcast %cst_56 : f32 to vector<8x32xf32>
    %176 = arith.cmpf ogt, %174, %175 : vector<8x32xf32>
    %cst_57 = arith.constant 2.000000e-01 : f32
    %177 = vector.broadcast %cst_57 : f32 to vector<8x32xf32>
    %178 = arith.mulf %177, %174 : vector<8x32xf32>
    %179 = arith.select %176, %174, %178 : vector<8x32xi1>, vector<8x32xf32>
    %180 = arith.mulf %179, %179 : vector<8x32xf32>
    %cst_58 = arith.constant dense<0.000000e+00> : vector<32xf32>
    %181 = vector.multi_reduction <add>, %180, %cst_58 [0] : vector<8x32xf32> to vector<32xf32>
    %182 = vector.shape_cast %181 : vector<32xf32> to vector<1x32xf32>
    %cst_59 = arith.constant 1.000000e-24 : f32
    %183 = vector.broadcast %cst_59 : f32 to vector<1x32xf32>
    %184 = arith.maximumf %182, %183 : vector<1x32xf32>
    %185 = math.rsqrt %184 : vector<1x32xf32>
    %186 = vector.broadcast %185 : vector<1x32xf32> to vector<8x32xf32>
    %187 = arith.mulf %179, %186 : vector<8x32xf32>
    %188 = arith.addf %150, %187 : vector<8x32xf32>
    %cst_60 = arith.constant 5.000000e-01 : f32
    %189 = vector.broadcast %cst_60 : f32 to vector<8x32xf32>
    %190 = arith.mulf %188, %189 : vector<8x32xf32>
    %191 = vector.broadcast %9 : vector<1x32xf32> to vector<8x32xf32>
    %192 = arith.addf %190, %191 : vector<8x32xf32>
    %cst_61 = arith.constant 0.000000e+00 : f32
    %193 = vector.broadcast %cst_61 : f32 to vector<8x32xf32>
    %194 = arith.cmpf ogt, %192, %193 : vector<8x32xf32>
    %cst_62 = arith.constant 0.000000e+00 : f32
    %195 = vector.broadcast %cst_62 : f32 to vector<8x32xf32>
    %196 = arith.minimumf %192, %195 : vector<8x32xf32>
    %197 = math.exp %196 : vector<8x32xf32>
    %cst_63 = arith.constant 1.000000e+00 : f32
    %198 = vector.broadcast %cst_63 : f32 to vector<8x32xf32>
    %199 = arith.subf %197, %198 : vector<8x32xf32>
    %200 = arith.select %194, %192, %199 : vector<8x32xi1>, vector<8x32xf32>
    %c1 = arith.constant 1 : index
    %c0_64 = arith.constant 0 : index
    %c0_65 = arith.constant 0 : index
    %201 = vector.load %arg7[%c1, %c0_64, %c0_65] : memref<2x8x32xf32, #tpu.memory_space<vmem>>, vector<1x8x32xf32>
    %202 = vector.shape_cast %201 : vector<1x8x32xf32> to vector<8x32xf32>
    %203 = vector.shape_cast %200 : vector<8x32xf32> to vector<1x8x32xf32>
    tpu.vector_store %arg7[%c1, %c0_64, %c0_65], %203 {strides = array<i32>} : memref<2x8x32xf32, #tpu.memory_space<vmem>>, vector<1x8x32xf32>,
    %c0_66 = arith.constant 0 : index
    %c0_67 = arith.constant 0 : index
    %c0_68 = arith.constant 0 : index
    %204 = vector.load %arg7[%c0_66, %c0_67, %c0_68] : memref<2x8x32xf32, #tpu.memory_space<vmem>>, vector<2x8x32xf32>
    %205 = vector.shape_cast %204 : vector<2x8x32xf32> to vector<16x32xf32>
    %c88 = arith.constant 88 : index
    %c0_69 = arith.constant 0 : index
    %206 = vector.load %arg3[%c88, %c0_69] : memref<296x128xf32, #tpu.memory_space<vmem>>, vector<32x64xf32>
    %cst_70 = arith.constant dense<0.000000e+00> : vector<16x64xf32>
    %207 = tpu.matmul %205, %206, %cst_70 {dimension_numbers = #tpu.dot_dimension_numbers<[1], [0], [0], [1], [0, 0, 1, 1], [], []>} : vector<16x32xf32>, vector<32x64xf32>, vector<16x64xf32> -> vector<16x64xf32>
    %c120 = arith.constant 120 : index
    %c0_71 = arith.constant 0 : index
    %208 = vector.load %arg3[%c120, %c0_71] : memref<296x128xf32, #tpu.memory_space<vmem>>, vector<64x4xf32>
    %cst_72 = arith.constant dense<0.000000e+00> : vector<16x4xf32>
    %209 = tpu.matmul %207, %208, %cst_72 {dimension_numbers = #tpu.dot_dimension_numbers<[1], [0], [0], [1], [0, 0, 1, 1], [], []>} : vector<16x64xf32>, vector<64x4xf32>, vector<16x4xf32> -> vector<16x4xf32>
    %c184 = arith.constant 184 : index
    %c0_73 = arith.constant 0 : index
    %210 = vector.load %arg3[%c184, %c0_73] : memref<296x128xf32, #tpu.memory_space<vmem>>, vector<1x32xf32>
    %211 = vector.extract_strided_slice %207 {offsets = [0, 0], sizes = [8, 64], strides = [1, 1]} : vector<16x64xf32> to vector<8x64xf32>
    %212 = vector.extract_strided_slice %209 {offsets = [0, 0], sizes = [8, 4], strides = [1, 1]} : vector<16x4xf32> to vector<8x4xf32>
    %213 = vector.extract_strided_slice %4 {offsets = [0, 0, 0], sizes = [1, 8, 8], strides = [1, 1, 1]} : vector<2x8x8xi1> to vector<1x8x8xi1>
    %214 = vector.shape_cast %213 : vector<1x8x8xi1> to vector<8x8xi1>
    %215 = tpu.transpose %212, [1, 0] : vector<8x4xf32> -> vector<4x8xf32>
    %cst_74 = arith.constant 0.000000e+00 : f32
    %216 = vector.broadcast %cst_74 : f32 to vector<8x32xf32>
    %217 = vector.extract_strided_slice %211 {offsets = [0, 0], sizes = [8, 32], strides = [1, 1]} : vector<8x64xf32> to vector<8x32xf32>
    %218 = vector.extract_strided_slice %212 {offsets = [0, 0], sizes = [8, 1], strides = [1, 1]} : vector<8x4xf32> to vector<8x1xf32>
    %219 = vector.extract_strided_slice %215 {offsets = [1, 0], sizes = [1, 8], strides = [1, 1]} : vector<4x8xf32> to vector<1x8xf32>
    %220 = vector.broadcast %218 : vector<8x1xf32> to vector<8x8xf32>
    %221 = vector.broadcast %219 : vector<1x8xf32> to vector<8x8xf32>
    %222 = arith.addf %220, %221 : vector<8x8xf32>
    %cst_75 = arith.constant 0.000000e+00 : f32
    %223 = vector.broadcast %cst_75 : f32 to vector<8x8xf32>
    %224 = arith.cmpf ogt, %222, %223 : vector<8x8xf32>
    %cst_76 = arith.constant 2.000000e-01 : f32
    %225 = vector.broadcast %cst_76 : f32 to vector<8x8xf32>
    %226 = arith.mulf %225, %222 : vector<8x8xf32>
    %227 = arith.select %224, %222, %226 : vector<8x8xi1>, vector<8x8xf32>
    %cst_77 = arith.constant -9.000000e+15 : f32
    %228 = vector.broadcast %cst_77 : f32 to vector<8x8xf32>
    %229 = arith.select %214, %227, %228 : vector<8x8xi1>, vector<8x8xf32>
    %cst_78 = arith.constant dense<0xFF800000> : vector<8xf32>
    %230 = vector.multi_reduction <maximumf>, %229, %cst_78 [0] : vector<8x8xf32> to vector<8xf32>
    %231 = vector.shape_cast %230 : vector<8xf32> to vector<1x8xf32>
    %232 = vector.broadcast %231 : vector<1x8xf32> to vector<8x8xf32>
    %233 = arith.subf %229, %232 : vector<8x8xf32>
    %234 = math.exp %233 : vector<8x8xf32>
    %cst_79 = arith.constant dense<0.000000e+00> : vector<8xf32>
    %235 = vector.multi_reduction <add>, %234, %cst_79 [0] : vector<8x8xf32> to vector<8xf32>
    %236 = vector.shape_cast %235 : vector<8xf32> to vector<1x8xf32>
    %237 = tpu.reciprocal %236 {approx = true} : vector<1x8xf32> -> vector<1x8xf32>
    %238 = vector.broadcast %237 : vector<1x8xf32> to vector<8x8xf32>
    %239 = arith.mulf %234, %238 : vector<8x8xf32>
    %cst_80 = arith.constant dense<0.000000e+00> : vector<8x32xf32>
    %240 = tpu.matmul %239, %217, %cst_80 {dimension_numbers = #tpu.dot_dimension_numbers<[1], [0], [0], [1], [0, 0, 1, 1], [], []>} : vector<8x8xf32>, vector<8x32xf32>, vector<8x32xf32> -> vector<8x32xf32>
    %cst_81 = arith.constant 0.000000e+00 : f32
    %241 = vector.broadcast %cst_81 : f32 to vector<8x32xf32>
    %242 = arith.cmpf ogt, %240, %241 : vector<8x32xf32>
    %cst_82 = arith.constant 2.000000e-01 : f32
    %243 = vector.broadcast %cst_82 : f32 to vector<8x32xf32>
    %244 = arith.mulf %243, %240 : vector<8x32xf32>
    %245 = arith.select %242, %240, %244 : vector<8x32xi1>, vector<8x32xf32>
    %246 = arith.mulf %245, %245 : vector<8x32xf32>
    %cst_83 = arith.constant dense<0.000000e+00> : vector<32xf32>
    %247 = vector.multi_reduction <add>, %246, %cst_83 [0] : vector<8x32xf32> to vector<32xf32>
    %248 = vector.shape_cast %247 : vector<32xf32> to vector<1x32xf32>
    %cst_84 = arith.constant 1.000000e-24 : f32
    %249 = vector.broadcast %cst_84 : f32 to vector<1x32xf32>
    %250 = arith.maximumf %248, %249 : vector<1x32xf32>
    %251 = math.rsqrt %250 : vector<1x32xf32>
    %252 = vector.broadcast %251 : vector<1x32xf32> to vector<8x32xf32>
    %253 = arith.mulf %245, %252 : vector<8x32xf32>
    %254 = arith.addf %216, %253 : vector<8x32xf32>
    %255 = vector.extract_strided_slice %211 {offsets = [0, 32], sizes = [8, 32], strides = [1, 1]} : vector<8x64xf32> to vector<8x32xf32>
    %256 = vector.extract_strided_slice %212 {offsets = [0, 2], sizes = [8, 1], strides = [1, 1]} : vector<8x4xf32> to vector<8x1xf32>
    %257 = vector.extract_strided_slice %215 {offsets = [3, 0], sizes = [1, 8], strides = [1, 1]} : vector<4x8xf32> to vector<1x8xf32>
    %258 = vector.broadcast %256 : vector<8x1xf32> to vector<8x8xf32>
    %259 = vector.broadcast %257 : vector<1x8xf32> to vector<8x8xf32>
    %260 = arith.addf %258, %259 : vector<8x8xf32>
    %cst_85 = arith.constant 0.000000e+00 : f32
    %261 = vector.broadcast %cst_85 : f32 to vector<8x8xf32>
    %262 = arith.cmpf ogt, %260, %261 : vector<8x8xf32>
    %cst_86 = arith.constant 2.000000e-01 : f32
    %263 = vector.broadcast %cst_86 : f32 to vector<8x8xf32>
    %264 = arith.mulf %263, %260 : vector<8x8xf32>
    %265 = arith.select %262, %260, %264 : vector<8x8xi1>, vector<8x8xf32>
    %cst_87 = arith.constant -9.000000e+15 : f32
    %266 = vector.broadcast %cst_87 : f32 to vector<8x8xf32>
    %267 = arith.select %214, %265, %266 : vector<8x8xi1>, vector<8x8xf32>
    %cst_88 = arith.constant dense<0xFF800000> : vector<8xf32>
    %268 = vector.multi_reduction <maximumf>, %267, %cst_88 [0] : vector<8x8xf32> to vector<8xf32>
    %269 = vector.shape_cast %268 : vector<8xf32> to vector<1x8xf32>
    %270 = vector.broadcast %269 : vector<1x8xf32> to vector<8x8xf32>
    %271 = arith.subf %267, %270 : vector<8x8xf32>
    %272 = math.exp %271 : vector<8x8xf32>
    %cst_89 = arith.constant dense<0.000000e+00> : vector<8xf32>
    %273 = vector.multi_reduction <add>, %272, %cst_89 [0] : vector<8x8xf32> to vector<8xf32>
    %274 = vector.shape_cast %273 : vector<8xf32> to vector<1x8xf32>
    %275 = tpu.reciprocal %274 {approx = true} : vector<1x8xf32> -> vector<1x8xf32>
    %276 = vector.broadcast %275 : vector<1x8xf32> to vector<8x8xf32>
    %277 = arith.mulf %272, %276 : vector<8x8xf32>
    %cst_90 = arith.constant dense<0.000000e+00> : vector<8x32xf32>
    %278 = tpu.matmul %277, %255, %cst_90 {dimension_numbers = #tpu.dot_dimension_numbers<[1], [0], [0], [1], [0, 0, 1, 1], [], []>} : vector<8x8xf32>, vector<8x32xf32>, vector<8x32xf32> -> vector<8x32xf32>
    %cst_91 = arith.constant 0.000000e+00 : f32
    %279 = vector.broadcast %cst_91 : f32 to vector<8x32xf32>
    %280 = arith.cmpf ogt, %278, %279 : vector<8x32xf32>
    %cst_92 = arith.constant 2.000000e-01 : f32
    %281 = vector.broadcast %cst_92 : f32 to vector<8x32xf32>
    %282 = arith.mulf %281, %278 : vector<8x32xf32>
    %283 = arith.select %280, %278, %282 : vector<8x32xi1>, vector<8x32xf32>
    %284 = arith.mulf %283, %283 : vector<8x32xf32>
    %cst_93 = arith.constant dense<0.000000e+00> : vector<32xf32>
    %285 = vector.multi_reduction <add>, %284, %cst_93 [0] : vector<8x32xf32> to vector<32xf32>
    %286 = vector.shape_cast %285 : vector<32xf32> to vector<1x32xf32>
    %cst_94 = arith.constant 1.000000e-24 : f32
    %287 = vector.broadcast %cst_94 : f32 to vector<1x32xf32>
    %288 = arith.maximumf %286, %287 : vector<1x32xf32>
    %289 = math.rsqrt %288 : vector<1x32xf32>
    %290 = vector.broadcast %289 : vector<1x32xf32> to vector<8x32xf32>
    %291 = arith.mulf %283, %290 : vector<8x32xf32>
    %292 = arith.addf %254, %291 : vector<8x32xf32>
    %cst_95 = arith.constant 5.000000e-01 : f32
    %293 = vector.broadcast %cst_95 : f32 to vector<8x32xf32>
    %294 = arith.mulf %292, %293 : vector<8x32xf32>
    %295 = vector.broadcast %210 : vector<1x32xf32> to vector<8x32xf32>
    %296 = arith.addf %294, %295 : vector<8x32xf32>
    %c0_96 = arith.constant 0 : index
    %c0_97 = arith.constant 0 : index
    %c0_98 = arith.constant 0 : index
    %297 = vector.load %arg8[%c0_96, %c0_97, %c0_98] : memref<2x8x32xf32, #tpu.memory_space<vmem>>, vector<1x8x32xf32>
    %298 = vector.shape_cast %297 : vector<1x8x32xf32> to vector<8x32xf32>
    %299 = vector.shape_cast %296 : vector<8x32xf32> to vector<1x8x32xf32>
    tpu.vector_store %arg8[%c0_96, %c0_97, %c0_98], %299 {strides = array<i32>} : memref<2x8x32xf32, #tpu.memory_space<vmem>>, vector<1x8x32xf32>,
    %300 = vector.extract_strided_slice %207 {offsets = [8, 0], sizes = [8, 64], strides = [1, 1]} : vector<16x64xf32> to vector<8x64xf32>
    %301 = vector.extract_strided_slice %209 {offsets = [8, 0], sizes = [8, 4], strides = [1, 1]} : vector<16x4xf32> to vector<8x4xf32>
    %302 = vector.extract_strided_slice %4 {offsets = [1, 0, 0], sizes = [1, 8, 8], strides = [1, 1, 1]} : vector<2x8x8xi1> to vector<1x8x8xi1>
    %303 = vector.shape_cast %302 : vector<1x8x8xi1> to vector<8x8xi1>
    %304 = tpu.transpose %301, [1, 0] : vector<8x4xf32> -> vector<4x8xf32>
    %cst_99 = arith.constant 0.000000e+00 : f32
    %305 = vector.broadcast %cst_99 : f32 to vector<8x32xf32>
    %306 = vector.extract_strided_slice %300 {offsets = [0, 0], sizes = [8, 32], strides = [1, 1]} : vector<8x64xf32> to vector<8x32xf32>
    %307 = vector.extract_strided_slice %301 {offsets = [0, 0], sizes = [8, 1], strides = [1, 1]} : vector<8x4xf32> to vector<8x1xf32>
    %308 = vector.extract_strided_slice %304 {offsets = [1, 0], sizes = [1, 8], strides = [1, 1]} : vector<4x8xf32> to vector<1x8xf32>
    %309 = vector.broadcast %307 : vector<8x1xf32> to vector<8x8xf32>
    %310 = vector.broadcast %308 : vector<1x8xf32> to vector<8x8xf32>
    %311 = arith.addf %309, %310 : vector<8x8xf32>
    %cst_100 = arith.constant 0.000000e+00 : f32
    %312 = vector.broadcast %cst_100 : f32 to vector<8x8xf32>
    %313 = arith.cmpf ogt, %311, %312 : vector<8x8xf32>
    %cst_101 = arith.constant 2.000000e-01 : f32
    %314 = vector.broadcast %cst_101 : f32 to vector<8x8xf32>
    %315 = arith.mulf %314, %311 : vector<8x8xf32>
    %316 = arith.select %313, %311, %315 : vector<8x8xi1>, vector<8x8xf32>
    %cst_102 = arith.constant -9.000000e+15 : f32
    %317 = vector.broadcast %cst_102 : f32 to vector<8x8xf32>
    %318 = arith.select %303, %316, %317 : vector<8x8xi1>, vector<8x8xf32>
    %cst_103 = arith.constant dense<0xFF800000> : vector<8xf32>
    %319 = vector.multi_reduction <maximumf>, %318, %cst_103 [0] : vector<8x8xf32> to vector<8xf32>
    %320 = vector.shape_cast %319 : vector<8xf32> to vector<1x8xf32>
    %321 = vector.broadcast %320 : vector<1x8xf32> to vector<8x8xf32>
    %322 = arith.subf %318, %321 : vector<8x8xf32>
    %323 = math.exp %322 : vector<8x8xf32>
    %cst_104 = arith.constant dense<0.000000e+00> : vector<8xf32>
    %324 = vector.multi_reduction <add>, %323, %cst_104 [0] : vector<8x8xf32> to vector<8xf32>
    %325 = vector.shape_cast %324 : vector<8xf32> to vector<1x8xf32>
    %326 = tpu.reciprocal %325 {approx = true} : vector<1x8xf32> -> vector<1x8xf32>
    %327 = vector.broadcast %326 : vector<1x8xf32> to vector<8x8xf32>
    %328 = arith.mulf %323, %327 : vector<8x8xf32>
    %cst_105 = arith.constant dense<0.000000e+00> : vector<8x32xf32>
    %329 = tpu.matmul %328, %306, %cst_105 {dimension_numbers = #tpu.dot_dimension_numbers<[1], [0], [0], [1], [0, 0, 1, 1], [], []>} : vector<8x8xf32>, vector<8x32xf32>, vector<8x32xf32> -> vector<8x32xf32>
    %cst_106 = arith.constant 0.000000e+00 : f32
    %330 = vector.broadcast %cst_106 : f32 to vector<8x32xf32>
    %331 = arith.cmpf ogt, %329, %330 : vector<8x32xf32>
    %cst_107 = arith.constant 2.000000e-01 : f32
    %332 = vector.broadcast %cst_107 : f32 to vector<8x32xf32>
    %333 = arith.mulf %332, %329 : vector<8x32xf32>
    %334 = arith.select %331, %329, %333 : vector<8x32xi1>, vector<8x32xf32>
    %335 = arith.mulf %334, %334 : vector<8x32xf32>
    %cst_108 = arith.constant dense<0.000000e+00> : vector<32xf32>
    %336 = vector.multi_reduction <add>, %335, %cst_108 [0] : vector<8x32xf32> to vector<32xf32>
    %337 = vector.shape_cast %336 : vector<32xf32> to vector<1x32xf32>
    %cst_109 = arith.constant 1.000000e-24 : f32
    %338 = vector.broadcast %cst_109 : f32 to vector<1x32xf32>
    %339 = arith.maximumf %337, %338 : vector<1x32xf32>
    %340 = math.rsqrt %339 : vector<1x32xf32>
    %341 = vector.broadcast %340 : vector<1x32xf32> to vector<8x32xf32>
    %342 = arith.mulf %334, %341 : vector<8x32xf32>
    %343 = arith.addf %305, %342 : vector<8x32xf32>
    %344 = vector.extract_strided_slice %300 {offsets = [0, 32], sizes = [8, 32], strides = [1, 1]} : vector<8x64xf32> to vector<8x32xf32>
    %345 = vector.extract_strided_slice %301 {offsets = [0, 2], sizes = [8, 1], strides = [1, 1]} : vector<8x4xf32> to vector<8x1xf32>
    %346 = vector.extract_strided_slice %304 {offsets = [3, 0], sizes = [1, 8], strides = [1, 1]} : vector<4x8xf32> to vector<1x8xf32>
    %347 = vector.broadcast %345 : vector<8x1xf32> to vector<8x8xf32>
    %348 = vector.broadcast %346 : vector<1x8xf32> to vector<8x8xf32>
    %349 = arith.addf %347, %348 : vector<8x8xf32>
    %cst_110 = arith.constant 0.000000e+00 : f32
    %350 = vector.broadcast %cst_110 : f32 to vector<8x8xf32>
    %351 = arith.cmpf ogt, %349, %350 : vector<8x8xf32>
    %cst_111 = arith.constant 2.000000e-01 : f32
    %352 = vector.broadcast %cst_111 : f32 to vector<8x8xf32>
    %353 = arith.mulf %352, %349 : vector<8x8xf32>
    %354 = arith.select %351, %349, %353 : vector<8x8xi1>, vector<8x8xf32>
    %cst_112 = arith.constant -9.000000e+15 : f32
    %355 = vector.broadcast %cst_112 : f32 to vector<8x8xf32>
    %356 = arith.select %303, %354, %355 : vector<8x8xi1>, vector<8x8xf32>
    %cst_113 = arith.constant dense<0xFF800000> : vector<8xf32>
    %357 = vector.multi_reduction <maximumf>, %356, %cst_113 [0] : vector<8x8xf32> to vector<8xf32>
    %358 = vector.shape_cast %357 : vector<8xf32> to vector<1x8xf32>
    %359 = vector.broadcast %358 : vector<1x8xf32> to vector<8x8xf32>
    %360 = arith.subf %356, %359 : vector<8x8xf32>
    %361 = math.exp %360 : vector<8x8xf32>
    %cst_114 = arith.constant dense<0.000000e+00> : vector<8xf32>
    %362 = vector.multi_reduction <add>, %361, %cst_114 [0] : vector<8x8xf32> to vector<8xf32>
    %363 = vector.shape_cast %362 : vector<8xf32> to vector<1x8xf32>
    %364 = tpu.reciprocal %363 {approx = true} : vector<1x8xf32> -> vector<1x8xf32>
    %365 = vector.broadcast %364 : vector<1x8xf32> to vector<8x8xf32>
    %366 = arith.mulf %361, %365 : vector<8x8xf32>
    %cst_115 = arith.constant dense<0.000000e+00> : vector<8x32xf32>
    %367 = tpu.matmul %366, %344, %cst_115 {dimension_numbers = #tpu.dot_dimension_numbers<[1], [0], [0], [1], [0, 0, 1, 1], [], []>} : vector<8x8xf32>, vector<8x32xf32>, vector<8x32xf32> -> vector<8x32xf32>
    %cst_116 = arith.constant 0.000000e+00 : f32
    %368 = vector.broadcast %cst_116 : f32 to vector<8x32xf32>
    %369 = arith.cmpf ogt, %367, %368 : vector<8x32xf32>
    %cst_117 = arith.constant 2.000000e-01 : f32
    %370 = vector.broadcast %cst_117 : f32 to vector<8x32xf32>
    %371 = arith.mulf %370, %367 : vector<8x32xf32>
    %372 = arith.select %369, %367, %371 : vector<8x32xi1>, vector<8x32xf32>
    %373 = arith.mulf %372, %372 : vector<8x32xf32>
    %cst_118 = arith.constant dense<0.000000e+00> : vector<32xf32>
    %374 = vector.multi_reduction <add>, %373, %cst_118 [0] : vector<8x32xf32> to vector<32xf32>
    %375 = vector.shape_cast %374 : vector<32xf32> to vector<1x32xf32>
    %cst_119 = arith.constant 1.000000e-24 : f32
    %376 = vector.broadcast %cst_119 : f32 to vector<1x32xf32>
    %377 = arith.maximumf %375, %376 : vector<1x32xf32>
    %378 = math.rsqrt %377 : vector<1x32xf32>
    %379 = vector.broadcast %378 : vector<1x32xf32> to vector<8x32xf32>
    %380 = arith.mulf %372, %379 : vector<8x32xf32>
    %381 = arith.addf %343, %380 : vector<8x32xf32>
    %cst_120 = arith.constant 5.000000e-01 : f32
    %382 = vector.broadcast %cst_120 : f32 to vector<8x32xf32>
    %383 = arith.mulf %381, %382 : vector<8x32xf32>
    %384 = vector.broadcast %210 : vector<1x32xf32> to vector<8x32xf32>
    %385 = arith.addf %383, %384 : vector<8x32xf32>
    %c1_121 = arith.constant 1 : index
    %c0_122 = arith.constant 0 : index
    %c0_123 = arith.constant 0 : index
    %386 = vector.load %arg8[%c1_121, %c0_122, %c0_123] : memref<2x8x32xf32, #tpu.memory_space<vmem>>, vector<1x8x32xf32>
    %387 = vector.shape_cast %386 : vector<1x8x32xf32> to vector<8x32xf32>
    %388 = vector.shape_cast %385 : vector<8x32xf32> to vector<1x8x32xf32>
    tpu.vector_store %arg8[%c1_121, %c0_122, %c0_123], %388 {strides = array<i32>} : memref<2x8x32xf32, #tpu.memory_space<vmem>>, vector<1x8x32xf32>,
    %c0_124 = arith.constant 0 : index
    %c0_125 = arith.constant 0 : index
    %c0_126 = arith.constant 0 : index
    %389 = vector.load %arg8[%c0_124, %c0_125, %c0_126] : memref<2x8x32xf32, #tpu.memory_space<vmem>>, vector<2x8x32xf32>
    %390 = vector.shape_cast %389 : vector<2x8x32xf32> to vector<16x32xf32>
    %c192 = arith.constant 192 : index
    %c0_127 = arith.constant 0 : index
    %391 = vector.load %arg3[%c192, %c0_127] : memref<296x128xf32, #tpu.memory_space<vmem>>, vector<32x16xf32>
    %cst_128 = arith.constant dense<0.000000e+00> : vector<16x16xf32>
    %392 = tpu.matmul %390, %391, %cst_128 {dimension_numbers = #tpu.dot_dimension_numbers<[1], [0], [0], [1], [0, 0, 1, 1], [], []>} : vector<16x32xf32>, vector<32x16xf32>, vector<16x16xf32> -> vector<16x16xf32>
    %c224 = arith.constant 224 : index
    %c0_129 = arith.constant 0 : index
    %393 = vector.load %arg3[%c224, %c0_129] : memref<296x128xf32, #tpu.memory_space<vmem>>, vector<1x16xf32>
    %394 = vector.broadcast %393 : vector<1x16xf32> to vector<16x16xf32>
    %395 = arith.addf %392, %394 : vector<16x16xf32>
    %cst_130 = arith.constant 0.000000e+00 : f32
    %396 = vector.broadcast %cst_130 : f32 to vector<16x16xf32>
    %397 = arith.cmpf ogt, %395, %396 : vector<16x16xf32>
    %cst_131 = arith.constant 0.00999999977 : f32
    %398 = vector.broadcast %cst_131 : f32 to vector<16x16xf32>
    %399 = arith.mulf %398, %395 : vector<16x16xf32>
    %400 = arith.select %397, %395, %399 : vector<16x16xi1>, vector<16x16xf32>
    %c232 = arith.constant 232 : index
    %c0_132 = arith.constant 0 : index
    %401 = vector.load %arg3[%c232, %c0_132] : memref<296x128xf32, #tpu.memory_space<vmem>>, vector<16x16xf32>
    %cst_133 = arith.constant dense<0.000000e+00> : vector<16x16xf32>
    %402 = tpu.matmul %400, %401, %cst_133 {dimension_numbers = #tpu.dot_dimension_numbers<[1], [0], [0], [1], [0, 0, 1, 1], [], []>} : vector<16x16xf32>, vector<16x16xf32>, vector<16x16xf32> -> vector<16x16xf32>
    %c248 = arith.constant 248 : index
    %c0_134 = arith.constant 0 : index
    %403 = vector.load %arg3[%c248, %c0_134] : memref<296x128xf32, #tpu.memory_space<vmem>>, vector<1x16xf32>
    %404 = vector.broadcast %403 : vector<1x16xf32> to vector<16x16xf32>
    %405 = arith.addf %402, %404 : vector<16x16xf32>
    %cst_135 = arith.constant 0.000000e+00 : f32
    %406 = vector.broadcast %cst_135 : f32 to vector<16x16xf32>
    %407 = arith.cmpf ogt, %405, %406 : vector<16x16xf32>
    %cst_136 = arith.constant 0.00999999977 : f32
    %408 = vector.broadcast %cst_136 : f32 to vector<16x16xf32>
    %409 = arith.mulf %408, %405 : vector<16x16xf32>
    %410 = arith.select %407, %405, %409 : vector<16x16xi1>, vector<16x16xf32>
    %c2_i32 = arith.constant 2 : i32
    %411 = arith.muli %arg0, %c2_i32 : i32
    %412 = tpu.iota {dimensions = array<i32: 0>} : vector<16x1xi32>
    %cst_137 = arith.constant 0.000000e+00 : f32
    %413 = vector.broadcast %cst_137 : f32 to vector<16x1xf32>
    %c0_i32 = arith.constant 0 : i32
    %414 = vector.broadcast %c0_i32 : i32 to vector<16x1xi32>
    %415 = arith.cmpi sge, %412, %414 : vector<16x1xi32>
    %c8_i32 = arith.constant 8 : i32
    %416 = vector.broadcast %c8_i32 : i32 to vector<16x1xi32>
    %417 = arith.cmpi slt, %412, %416 : vector<16x1xi32>
    %418 = arith.andi %415, %417 : vector<16x1xi1>
    %c0_i32_138 = arith.constant 0 : i32
    %419 = arith.addi %411, %c0_i32_138 : i32
    %420 = arith.index_cast %419 : i32 to index
    %421 = memref.load %arg4[%420] : memref<2xf32, #tpu.memory_space<smem>>
    %422 = vector.broadcast %421 : f32 to vector<16x1xf32>
    %423 = arith.select %418, %422, %413 : vector<16x1xi1>, vector<16x1xf32>
    %c8_i32_139 = arith.constant 8 : i32
    %424 = vector.broadcast %c8_i32_139 : i32 to vector<16x1xi32>
    %425 = arith.cmpi sge, %412, %424 : vector<16x1xi32>
    %c16_i32 = arith.constant 16 : i32
    %426 = vector.broadcast %c16_i32 : i32 to vector<16x1xi32>
    %427 = arith.cmpi slt, %412, %426 : vector<16x1xi32>
    %428 = arith.andi %425, %427 : vector<16x1xi1>
    %c1_i32 = arith.constant 1 : i32
    %429 = arith.addi %411, %c1_i32 : i32
    %430 = arith.index_cast %429 : i32 to index
    %431 = memref.load %arg4[%430] : memref<2xf32, #tpu.memory_space<smem>>
    %432 = vector.broadcast %431 : f32 to vector<16x1xf32>
    %433 = arith.select %428, %432, %423 : vector<16x1xi1>, vector<16x1xf32>
    %c0_140 = arith.constant 0 : index
    %434 = memref.load %arg5[%c0_140] : memref<2xf32, #tpu.memory_space<smem>>
    %435 = vector.broadcast %434 : f32 to vector<16x1xf32>
    %436 = arith.mulf %433, %435 : vector<16x1xf32>
    %c1_141 = arith.constant 1 : index
    %437 = memref.load %arg5[%c1_141] : memref<2xf32, #tpu.memory_space<smem>>
    %438 = vector.broadcast %437 : f32 to vector<16x1xf32>
    %439 = arith.addf %436, %438 : vector<16x1xf32>
    %cst_142 = arith.constant 0.000000e+00 : f32
    %440 = vector.broadcast %cst_142 : f32 to vector<16x1xf32>
    %441 = arith.subf %440, %439 : vector<16x1xf32>
    %442 = math.exp %441 : vector<16x1xf32>
    %cst_143 = arith.constant 1.000000e+00 : f32
    %443 = vector.broadcast %cst_143 : f32 to vector<16x1xf32>
    %444 = arith.addf %443, %442 : vector<16x1xf32>
    %cst_144 = arith.constant 1.000000e+00 : f32
    %445 = vector.broadcast %cst_144 : f32 to vector<16x1xf32>
    %446 = arith.divf %445, %444 : vector<16x1xf32>
    %cst_145 = arith.constant 1.000000e+00 : f32
    %447 = vector.broadcast %cst_145 : f32 to vector<16x1xf32>
    %448 = arith.subf %447, %446 : vector<16x1xf32>
    %449 = vector.broadcast %448 : vector<16x1xf32> to vector<16x16xf32>
    %450 = arith.mulf %449, %410 : vector<16x16xf32>
    %451 = vector.broadcast %446 : vector<16x1xf32> to vector<16x16xf32>
    %452 = arith.mulf %451, %1 : vector<16x16xf32>
    %453 = arith.addf %450, %452 : vector<16x16xf32>
    %c256 = arith.constant 256 : index
    %c0_146 = arith.constant 0 : index
    %454 = vector.load %arg3[%c256, %c0_146] : memref<296x128xf32, #tpu.memory_space<vmem>>, vector<16x16xf32>
    %cst_147 = arith.constant dense<0.000000e+00> : vector<16x16xf32>
    %455 = tpu.matmul %1, %454, %cst_147 {dimension_numbers = #tpu.dot_dimension_numbers<[1], [0], [0], [1], [0, 0, 1, 1], [], []>} : vector<16x16xf32>, vector<16x16xf32>, vector<16x16xf32> -> vector<16x16xf32>
    %c272 = arith.constant 272 : index
    %c0_148 = arith.constant 0 : index
    %456 = vector.load %arg3[%c272, %c0_148] : memref<296x128xf32, #tpu.memory_space<vmem>>, vector<16x16xf32>
    %cst_149 = arith.constant dense<0.000000e+00> : vector<16x16xf32>
    %457 = tpu.matmul %453, %456, %cst_149 {dimension_numbers = #tpu.dot_dimension_numbers<[1], [0], [0], [1], [0, 0, 1, 1], [], []>} : vector<16x16xf32>, vector<16x16xf32>, vector<16x16xf32> -> vector<16x16xf32>
    %458 = arith.addf %455, %457 : vector<16x16xf32>
    %c288 = arith.constant 288 : index
    %c0_150 = arith.constant 0 : index
    %459 = vector.load %arg3[%c288, %c0_150] : memref<296x128xf32, #tpu.memory_space<vmem>>, vector<1x16xf32>
    %460 = vector.broadcast %459 : vector<1x16xf32> to vector<16x16xf32>
    %461 = arith.addf %458, %460 : vector<16x16xf32>
    %462 = vector.shape_cast %461 : vector<16x16xf32> to vector<2x8x16xf32>
    %c0_151 = arith.constant 0 : index
    %c0_152 = arith.constant 0 : index
    %c0_153 = arith.constant 0 : index
    %463 = vector.load %arg6[%c0_151, %c0_152, %c0_153] : memref<2x8x16xf32, #tpu.memory_space<vmem>>, vector<2x8x16xf32>
    tpu.vector_store %arg6[%c0_151, %c0_152, %c0_153], %462 {strides = array<i32>} : memref<2x8x16xf32, #tpu.memory_space<vmem>>, vector<2x8x16xf32>,
    return
  }
  func.func @transform_0(%arg0: i32) -> (i32, i32, i32) {
    %c0_i32 = arith.constant 0 : i32
    %c0_i32_0 = arith.constant 0 : i32
    %c0_i32_1 = arith.constant 0 : i32
    return %arg0, %c0_i32, %c0_i32_0 : i32, i32, i32
  }
  func.func @transform_1(%arg0: i32) -> (i32, i32, i32) {
    %c0_i32 = arith.constant 0 : i32
    %c0_i32_0 = arith.constant 0 : i32
    %c0_i32_1 = arith.constant 0 : i32
    return %arg0, %c0_i32, %c0_i32_0 : i32, i32, i32
  }
  func.func @transform_2(%arg0: i32) -> (i32, i32) {
    %c0_i32 = arith.constant 0 : i32
    %c0_i32_0 = arith.constant 0 : i32
    %c0_i32_1 = arith.constant 0 : i32
    return %c0_i32, %c0_i32_0 : i32, i32
  }
  func.func @transform_3(%arg0: i32) -> i32 {
    %c0_i32 = arith.constant 0 : i32
    %c0_i32_0 = arith.constant 0 : i32
    return %c0_i32 : i32
  }
  func.func @transform_4(%arg0: i32) -> i32 {
    %c0_i32 = arith.constant 0 : i32
    %c0_i32_0 = arith.constant 0 : i32
    return %c0_i32 : i32
  }
  func.func @transform_5(%arg0: i32) -> (i32, i32, i32) {
    %c0_i32 = arith.constant 0 : i32
    %c0_i32_0 = arith.constant 0 : i32
    %c0_i32_1 = arith.constant 0 : i32
    return %arg0, %c0_i32, %c0_i32_0 : i32, i32, i32
  }
}

</mosaic_0001>

<bundles_post_ra>
// kernel: tpu_custom_call.1
= control target key start
LH: loop header
LB: loop body
LE: loop exit
PB: predicated region body
PF: predicated region fallthrough
CT: control target
= control target key end

     0   :  { %10 = vsyncpa [#allocation5], 0  ;;  %s2759_s0 = inlined_call_operand.hbm [shape: f32[2,8,16], index: 0, kind: input, shape index: {}]   ;;  %s2760_s1 = inlined_call_operand.hbm [shape: f32[2,8,8], index: 1, kind: input, shape index: {}]   ;;  %s2761_s2 = inlined_call_operand.hbm [shape: f32[296,128], index: 2, kind: input, shape index: {}]   ;;  %s2762_s3 = inlined_call_operand.vmem [shape: f32[2], index: 3, kind: input, shape index: {}]   ;;  %s2763_s4 = inlined_call_operand.vmem [shape: f32[2], index: 4, kind: input, shape index: {}]   ;;  %s2764_s5 = inlined_call_operand.hbm [shape: f32[2,8,16], index: 5, kind: output, shape index: {}]  }
   0x1   :  { %11 = vsyncpa [#allocation9], 0 }
   0x2   :  { %12 = vsyncpa [#allocation7], 0 }
   0x3   :  { %13 = vsyncpa [#allocation13], 0 }
   0x4   :  { %14 = vsyncpa [#allocation6], 0  ;;  %s2512_s18 = smov [#allocation8]   ;;  %s2513_s20 = smov [#allocation4]  }
   0x5   :  { %s32_s19 = sshll.u32 %s2512_s18, 4  ;;  %s20_s21 = sshll.u32 %s2513_s20, 4  ;;  %s33_s19 = int_to_ptr.vmem [resolvable:$true] %s32_s19  ;;  %s2555_s21 = int_to_ptr.vmem [resolvable:$true] %s20_s21 }
   0x6   :  { %s2390_s24 = scalar_lea.hbm %s2760_s1, 256 }
   0x7   :  { %p2391_p0 = scmp.ne.s32.totalorder %s2760_s1, %s2390_s24  ;;  %p2394_p1 = scmp.lt.u32.totalorder %s2390_s24, %s2760_s1 }
   0x9   :  { %p2396_p2 = pnand %p2394_p1, %p2391_p0 }
   0xb   :  { %2399 = shalt.err (!%p2396_p2)
}
   0xc   :  { %s2400_s29 = scalar_lea.vmem %s33_s19, 256  ;;  %p2405_p4 = scmp.lt.s32.totalorder %s33_s19, %s33_s19 }
   0xd   :  { %p2401_p3 = scmp.ne.s32.totalorder %s33_s19, %s2400_s29  ;;  %p2406_p5 = scmp.lt.s32.totalorder %s2400_s29, %s2400_s29 }
   0xf   :  { %p2407_p6 = por %p2406_p5, %p2405_p4 }
  0x11   :  { %p2408_p7 = pnand %p2407_p6, %p2401_p3 }
  0x13   :  { %2411 = shalt.err (!%p2408_p7)
}
  0x14   :  { %s2514_s30 = smov 128   ;;  %s2515_s6 = smov 8  }
  0x15   :  { %38 = dma.hbm_to_vmem [thread:$0]  %s2760_s1, 256, %s33_s19, [#allocation9], %s2514_s30, %s2514_s30, %s2515_s6  }
  0x16   :  { %s2412_s11 = scalar_lea.hbm %s2759_s0, 256 }
  0x17   :  { %p2413_p8 = scmp.ne.s32.totalorder %s2759_s0, %s2412_s11  ;;  %p2416_p9 = scmp.lt.u32.totalorder %s2412_s11, %s2759_s0 }
  0x19   :  { %p2418_p10 = pnand %p2416_p9, %p2413_p8 }
  0x1b   :  { %2421 = shalt.err (!%p2418_p10)
}
  0x1c   :  { %s2422_s16 = scalar_lea.vmem %s2555_s21, 256  ;;  %p2427_p12 = scmp.lt.s32.totalorder %s2555_s21, %s2555_s21 }
  0x1d   :  { %p2423_p11 = scmp.ne.s32.totalorder %s2555_s21, %s2422_s16  ;;  %p2428_p13 = scmp.lt.s32.totalorder %s2422_s16, %s2422_s16 }
  0x1f   :  { %p2429_p0 = por %p2428_p13, %p2427_p12 }
  0x21   :  { %p2430_p1 = pnand %p2429_p0, %p2423_p11 }
  0x23   :  { %2433 = shalt.err (!%p2430_p1)
}
  0x24   :  { %26 = dma.hbm_to_vmem [thread:$0]  %s2759_s0, 256, %s2555_s21, [#allocation5], %s2514_s30, %s2514_s30, %s2515_s6  }
  0x25   :  { %s57_s20 = sshll.u32 %s2762_s3, 4  ;;  %s2516_s22 = smov [#allocation10]   ;;  %s58_s20 = int_to_ptr.vmem [resolvable:$true] %s57_s20 }
  0x26   :  { %s44_s23 = sshll.u32 %s2516_s22, 4  ;;  %s2434_s26 = scalar_lea.hbm %s2761_s2, 4736  ;;  %s45_s23 = int_to_ptr.vmem [resolvable:$true] %s44_s23 }
  0x27   :  { %p2435_p2 = scmp.ne.s32.totalorder %s2761_s2, %s2434_s26  ;;  %p2438_p3 = scmp.lt.u32.totalorder %s2434_s26, %s2761_s2 }
  0x29   :  { %p2440_p4 = pnand %p2438_p3, %p2435_p2 }
  0x2b   :  { %2443 = shalt.err (!%p2440_p4)
}
  0x2c   :  { %s2444_s0 = scalar_lea.vmem %s45_s23, 4736  ;;  %p2449_p6 = scmp.lt.s32.totalorder %s45_s23, %s45_s23 }
  0x2d   :  { %p2445_p5 = scmp.ne.s32.totalorder %s45_s23, %s2444_s0  ;;  %p2450_p7 = scmp.lt.s32.totalorder %s2444_s0, %s2444_s0 }
  0x2f   :  { %p2451_p8 = por %p2450_p7, %p2449_p6 }
  0x31   :  { %p2452_p9 = pnand %p2451_p8, %p2445_p5 }
  0x33   :  { %2455 = shalt.err (!%p2452_p9)
}
  0x34   :  { %50 = dma.hbm_to_vmem [thread:$0]  %s2761_s2, 4736, %s45_s23, [#allocation9], %s2514_s30, %s2514_s30, %s2515_s6  }
  0x35   :  { %s2456_s8 = scalar_lea.vmem %s58_s20, 16  ;;  %p2461_p11 = scmp.lt.s32.totalorder %s58_s20, %s58_s20 }
  0x36   :  { %p2457_p10 = scmp.ne.s32.totalorder %s58_s20, %s2456_s8  ;;  %p2462_p12 = scmp.lt.s32.totalorder %s2456_s8, %s2456_s8 }
  0x38   :  { %p2463_p13 = por %p2462_p12, %p2461_p11 }
  0x3a   :  { %p2464_p0 = pnand %p2463_p13, %p2457_p10 }
  0x3c   :  { %2467 = shalt.err (!%p2464_p0)
}
  0x3d   :  { %s2517_s9 = smov [#allocation11]   ;;  %s67_s12 = sshll.u32 %s2763_s4, 4  ;;  %s68_s12 = int_to_ptr.vmem [resolvable:$true] %s67_s12 }
  0x3e   :  { %60 = dma.vmem_to_smem %s58_s20, 16, %s2517_s9, [#allocation7]  }
  0x3f   :  { %s2468_s13 = scalar_lea.vmem %s68_s12, 16  ;;  %p2473_p2 = scmp.lt.s32.totalorder %s68_s12, %s68_s12 }
  0x40   :  { %p2469_p1 = scmp.ne.s32.totalorder %s68_s12, %s2468_s13  ;;  %p2474_p3 = scmp.lt.s32.totalorder %s2468_s13, %s2468_s13 }
  0x42   :  { %p2475_p4 = por %p2474_p3, %p2473_p2 }
  0x44   :  { %p2476_p5 = pnand %p2475_p4, %p2469_p1 }
  0x46   :  { %2479 = shalt.err (!%p2476_p5)
}
  0x47   :  { %s2518_s2 = smov [#allocation12]  }
  0x48   :  { %70 = dma.vmem_to_smem %s68_s12, 16, %s2518_s2, [#allocation13]  }
  0x49   :  { %2502 = dma.done.wait [#allocation5], 256  }
  0x4a   :  { %2503 = vsyncadd [#allocation5], 4294967040 }
  0x4b   :  { %2504 = dma.done.wait [#allocation9], 4992  }
  0x4c   :  { %2505 = vsyncadd [#allocation9], 4294962304 }
  0x4d   :  { %2506 = dma.done.wait [#allocation7], 16  }
  0x4e   :  { %2507 = vsyncadd [#allocation7], 4294967280 }
  0x4f   :  { %2508 = dma.done.wait [#allocation13], 16  }
  0x50   :  { %2509 = vsyncadd [#allocation13], 4294967280 }
  0x51   :  { %86 = sfence }
  0x52   :  { %v93_v0 = vld [vmem:[#allocation10] sm:$0xff]  ;;  %v94_v1 = vld [vmem:[#allocation10 + $0x8] sm:$0xff]  ;;  %vm95_vm0 = vcmask 130048   ;;  %v177_v4 = vld [vmem:[#allocation10 + $0x10] sm:$0xff]  ;;  %v2519_v17 = vmov 0.0   ;;  %v2520_v18 = vmov 0   ;;  %v305_v24 = vlaneseq }
  0x53   :  { %v87_v2 = vld [vmem:[#allocation4] sm:$0xff]  ;;  %v2244_v3 = vpack.c.bf16 %v94_v1, %v93_v0  ;;  %v178_v5 = vld [vmem:[#allocation10 + $0x18] sm:$0xff]  ;;  %v180_v7 = vld [vmem:[#allocation10 + $0x28] sm:$0xff]  ;;  %2142 = vmatprep.subr.mxu0 %v2519_v17  ;;  %2323 = vset.pattern.permute.xlu1 %v2520_v18  ;;  %vm185_vm1 = vcmask 523264   ;;  %v2521_v23 = vmov 2   ;;  %s2522_s4 = smov 96  }
  0x54   :  { %2120 = vmatprep.mubr.msk.f32.mxu1 %vm95_vm0, %v87_v2  ;;  %v179_v6 = vld [vmem:[#allocation10 + $0x20] sm:$0xff]  ;;  %v2248_v8 = vpack.c.bf16 %v178_v5, %v177_v4  ;;  %v88_v9 = vld [vmem:[#allocation4 + $0x8] sm:$0xff]  ;;  %v181_v11 = vld [vmem:[#allocation10 + $0x30] sm:$0xff]  ;;  %2325 = vset.pattern.permute.xlu0 %v2520_v18  ;;  %vm2523_vm2 = vmmov 0   ;;  %v306_v26 = vshrl.u32 %v305_v24, 7  ;;  %vm314_vm6 = vcmask 64512  }
  0x55   :  { %2245 = vmatprep.subr.bf16.mxu1 %v2244_v3  ;;  %v2252_v10 = vpack.c.bf16 %v180_v7, %v179_v6  ;;  %v182_v12 = vld [vmem:[#allocation10 + $0x38] sm:$0xff]  ;;  %v183_v14 = vld [vmem:[#allocation10 + $0x40] sm:$0xff]  ;;  %v184_v15 = vld [vmem:[#allocation10 + $0x48] sm:$0xff]  ;;  %2144 = vmatprep.mubr.msk.f32.mxu0 %vm2523_vm2, %v2519_v17  ;;  %vm411_vm11 = vcmask 261120   ;;  %s1802_s14 = sld [smem:[#allocation12]]  ;;  %s2045_s15 = sld [smem:[#allocation11 + $0x1]] }
  0x56   :  { %2247 = vmatpush3.bf16.msra.mxu1 %v2244_v3  ;;  %v2256_v13 = vpack.c.bf16 %v182_v12, %v181_v11  ;;  %v2260_v16 = vpack.c.bf16 %v184_v15, %v183_v14  ;;  %v2627_v29 = vsub.s32 1, %v306_v26  ;;  %v2629_v30 = vsub.s32 3, %v306_v26  ;;  %v2631_v32 = vld [vmem:[#allocation8 + $0x8] sm:$0xff]  ;;  %v2642_v49 = vld [vmem:[#allocation8] sm:$0xff]  ;;  %s1787_s16 = sld [smem:[#allocation11]]  ;;  %s2046_s1 = sld [smem:[#allocation12 + $0x1]] }
  0x57   :  { %2249 = vmatprep.subr.bf16.mxu1 %v2248_v8  ;;  %vm92_vm3 = vcmp.gt.f32.partialorder %v2631_v32, 0.0  ;;  %vm91_vm7 = vcmp.gt.f32.partialorder %v2642_v49, 0.0  ;;  %s2524_s17 = smov [#allocation14]  }
  0x58   :  { %s2004_s18 = sshll.u32 %s2524_s17, 4  ;;  %s2005_s18 = int_to_ptr.vmem [resolvable:$true] %s2004_s18 }
  0x59   :  { %2121 = vmatmul.mubr.msk.f32.vlgmr.msra.gmra.mrb[0].mxu1 %vm95_vm0, %v88_v9  ;;  %s2480_s19 = scalar_lea.vmem %s2005_s18, 256  ;;  %p2485_p7 = scmp.lt.s32.totalorder %s2005_s18, %s2005_s18 }
  0x5a   :  { %2251 = vmatpush3.bf16.msra.mxu1 %v2248_v8  ;;  %p2481_p6 = scmp.ne.s32.totalorder %s2005_s18, %s2480_s19  ;;  %p2486_p8 = scmp.lt.s32.totalorder %s2480_s19, %s2480_s19 }
  0x5b   :  { %2253 = vmatprep.subr.bf16.mxu1 %v2252_v10 }
  0x5c   :  { %p2487_p9 = por %p2486_p8, %p2485_p7 }
  0x5e   :  { %2255 = vmatpush3.bf16.msra.mxu1 %v2252_v10  ;;  %p2488_p10 = pnand %p2487_p9, %p2481_p6 }
  0x5f   :  { %2257 = vmatprep.subr.bf16.mxu1 %v2256_v13 }
  0x62   :  { %2259 = vmatpush3.bf16.msra.mxu1 %v2256_v13 }
  0x63   :  { %2261 = vmatprep.subr.bf16.mxu1 %v2260_v16 }
  0x66   :  { %2263 = vmatpush3.bf16.msra.mxu1 %v2260_v16 }
 0x12c   :  { %v2616_v19 = vpop.f32.mrb[0].mxu1 }
 0x12d   :  { %v168_v20 = vpop.f32.mrb[1].mxu1 }
 0x12e   :  { %2139 = vmatprep.mubr.msk.f32.mxu1 %vm185_vm1, %v168_v20  ;;  %2143 = vmatpush3.msra.mxu0 %v168_v20 }
 0x12f   :  { %2140 = vmatmul.mubr.msk.f32.vlgmr.msra.gmra.mrb[2].mxu1 %vm185_vm1, %v2616_v19  ;;  %2147 = vmatprep.subr.mxu0 %v2519_v17 }
 0x202   :  { %v2141_v21 = vpop.f32.mrb[2].mxu1 }
 0x203   :  { %593 = vperm.xlu1 %2323, %v2141_v21   ;;  %v258_v22 = vpop.f32.mrb[3].mxu1 }
 0x204   :  { %302 = vperm.xlu0 %2325, %v258_v22  }
 0x207   :  { %2324 = vset.pattern.permute.xlu1 %v2521_v23 }
 0x208   :  { %713 = vperm.xlu1 %2324, %v2141_v21   ;;  %2326 = vset.pattern.permute.xlu0 %v2521_v23 }
 0x209   :  { %424 = vperm.xlu0 %2326, %v258_v22  }
 0x227   :  { %559 = vxpose.xlu0.b32.start.end [1/1] (short) (narrow) %v2141_v21, 8 }
 0x231   :  { %268 = vxpose.xlu1.b32.start.end [1/1] (short) (narrow) %v258_v22, 8 }
 0x24f   :  { %744 = vrot.lane.b32.xlu1 %v2616_v19, %s2522_s4 }
 0x250   :  { %455 = vrot.lane.b32.xlu0 %v168_v20, %s2522_s4  ;;  %2327 = vset.pattern.permute.xlu1 %v2520_v18 }
 0x282   :  { %v594_v27 = vpop.permute.xlu1 %593 }
 0x283   :  { %v303_v25 = vpop.permute.xlu0 %302 }
 0x287   :  { %v714_v35 = vpop.permute.xlu1 %713 }
 0x288   :  { %v425_v28 = vpop.permute.xlu0 %424 }
 0x2a7   :  { %v575_v31 = vpop.trf.xlu0 }
 0x2a8   :  { %v599_v33 = vrot.slane %v575_v31, %v2627_v29  ;;  %v719_v34 = vrot.slane %v575_v31, %v2629_v30 }
 0x2aa   :  { %v600_v36 = vadd.f32 %v599_v33, %v594_v27  ;;  %v720_v37 = vadd.f32 %v719_v34, %v714_v35 }
 0x2ac   :  { %vm601_vm4 = vcmp.gt.f32.partialorder %v600_v36, 0.0  ;;  %v602_v38 = vmul.f32 0.2, %v600_v36  ;;  %vm721_vm5 = vcmp.gt.f32.partialorder %v720_v37, 0.0  ;;  %v722_v39 = vmul.f32 0.2, %v720_v37 }
 0x2ae   :  { %v603_v40 = vsel %vm601_vm4, %v600_v36, %v602_v38  ;;  %v723_v41 = vsel %vm721_vm5, %v720_v37, %v722_v39 }
 0x2af   :  { %v604_v42 = vsel %vm92_vm3, %v603_v40, -9e+15  ;;  %v724_v43 = vsel %vm92_vm3, %v723_v41, -9e+15 }
 0x2b0   :  { %v605_v44 = vsel %vm314_vm6, %v604_v42, -inf  ;;  %v725_v45 = vsel %vm314_vm6, %v724_v43, -inf }
 0x2b1   :  { %v606_v46 = vrot.slane %v605_v44, 4  ;;  %v726_v47 = vrot.slane %v725_v45, 4  ;;  %v284_v48 = vpop.trf.xlu1 }
 0x2b2   :  { %v308_v50 = vrot.slane %v284_v48, %v2627_v29  ;;  %v430_v51 = vrot.slane %v284_v48, %v2629_v30 }
 0x2b3   :  { %v607_v52 = vmax.f32 %v605_v44, %v606_v46  ;;  %v727_v53 = vmax.f32 %v725_v45, %v726_v47 }
 0x2b4   :  { %v309_v54 = vadd.f32 %v308_v50, %v303_v25  ;;  %v431_v55 = vadd.f32 %v430_v51, %v425_v28 }
 0x2b5   :  { %v608_v56 = vrot.slane %v607_v52, 2  ;;  %v728_v57 = vrot.slane %v727_v53, 2 }
 0x2b6   :  { %vm310_vm8 = vcmp.gt.f32.partialorder %v309_v54, 0.0  ;;  %v311_v58 = vmul.f32 0.2, %v309_v54  ;;  %vm432_vm9 = vcmp.gt.f32.partialorder %v431_v55, 0.0  ;;  %v433_v59 = vmul.f32 0.2, %v431_v55 }
 0x2b7   :  { %v609_v60 = vmax.f32 %v607_v52, %v608_v56  ;;  %v729_v61 = vmax.f32 %v727_v53, %v728_v57 }
 0x2b8   :  { %v312_v62 = vsel %vm310_vm8, %v309_v54, %v311_v58  ;;  %v434_v63 = vsel %vm432_vm9, %v431_v55, %v433_v59 }
 0x2b9   :  { %v610_v0 = vrot.slane %v609_v60, 1  ;;  %v730_v1 = vrot.slane %v729_v61, 1  ;;  %v313_v2 = vsel %vm91_vm7, %v312_v62, -9e+15  ;;  %v435_v3 = vsel %vm91_vm7, %v434_v63, -9e+15 }
 0x2ba   :  { %v315_v4 = vsel %vm314_vm6, %v313_v2, -inf  ;;  %v436_v5 = vsel %vm314_vm6, %v435_v3, -inf }
 0x2bb   :  { %v611_v6 = vmax.f32 %v609_v60, %v610_v0  ;;  %v731_v7 = vmax.f32 %v729_v61, %v730_v1  ;;  %v316_v8 = vrot.slane %v315_v4, 4  ;;  %v437_v9 = vrot.slane %v436_v5, 4 }
 0x2bd   :  { %v612_v10 = vsub.f32 %v604_v42, %v611_v6  ;;  %v732_v11 = vsub.f32 %v724_v43, %v731_v7  ;;  %v317_v12 = vmax.f32 %v315_v4, %v316_v8  ;;  %v438_v13 = vmax.f32 %v436_v5, %v437_v9 }
 0x2bf   :  { %v613_v14 = vmul.f32 1.442695, %v612_v10  ;;  %v318_v15 = vrot.slane %v317_v12, 2  ;;  %v439_v16 = vrot.slane %v438_v13, 2  ;;  %v733_v18 = vmul.f32 1.442695, %v732_v11 }
 0x2c1   :  { %2328 = vpow2.f32 %v613_v14  ;;  %v319_v20 = vmax.f32 %v317_v12, %v318_v15  ;;  %v440_v21 = vmax.f32 %v438_v13, %v439_v16  ;;  %v745_v10 = vpop.permute.xlu1 %744  ;;  %v847_v12 = vld [vmem:[#allocation10 + $0x58] sm:$0xff]  ;;  %v848_v13 = vld [vmem:[#allocation10 + $0x60] sm:$0xff]  ;;  %v849_v14 = vld [vmem:[#allocation10 + $0x68] sm:$0xff] }
 0x2c2   :  { %2330 = vpow2.f32 %v733_v18  ;;  %v456_v5 = vpop.permute.xlu0 %455  ;;  %v850_v15 = vld [vmem:[#allocation10 + $0x70] sm:$0xff]  ;;  %v932_v18 = vld [vmem:[#allocation10 + $0x78] sm:$0xff] }
 0x2c3   :  { %v320_v22 = vrot.slane %v319_v20, 1  ;;  %v441_v23 = vrot.slane %v440_v21, 1  ;;  %v2268_v16 = vpack.c.bf16 %v850_v15, %v849_v14 }
 0x2c5   :  { %v321_v24 = vmax.f32 %v319_v20, %v320_v22  ;;  %v442_v25 = vmax.f32 %v440_v21, %v441_v23  ;;  %v933_v20 = vld [vmem:[#allocation10 + $0x80] sm:$0xff]  ;;  %v934_v21 = vld [vmem:[#allocation10 + $0x88] sm:$0xff]  ;;  %v935_v23 = vld [vmem:[#allocation10 + $0x90] sm:$0xff] }
 0x2c6   :  { %v2272_v22 = vpack.c.bf16 %v933_v20, %v932_v18 }
 0x2c7   :  { %v322_v26 = vsub.f32 %v313_v2, %v321_v24  ;;  %v443_v27 = vsub.f32 %v435_v3, %v442_v25  ;;  %v2276_v24 = vpack.c.bf16 %v935_v23, %v934_v21  ;;  %v936_v25 = vld [vmem:[#allocation10 + $0x98] sm:$0xff] }
 0x2c9   :  { %v323_v28 = vmul.f32 1.442695, %v322_v26  ;;  %v444_v31 = vmul.f32 1.442695, %v443_v27  ;;  %v937_v26 = vld [vmem:[#allocation10 + $0xa0] sm:$0xff] }
 0x2ca   :  { %v2280_v27 = vpack.c.bf16 %v937_v26, %v936_v25 }
 0x2cb   :  { %v2329_v33 = vpop.eup %2328  ;;  %2332 = vpow2.f32 %v323_v28  ;;  %v938_v28 = vld [vmem:[#allocation10 + $0xa8] sm:$0xff] }
 0x2cc   :  { %2334 = vpow2.f32 %v444_v31  ;;  %v615_v34 = vsel %vm314_vm6, %v2329_v33, 0.0  ;;  %v2331_v35 = vpop.eup %2330  ;;  %v939_v31 = vld [vmem:[#allocation10 + $0xb0] sm:$0xff] }
 0x2cd   :  { %v616_v36 = vrot.slane %v615_v34, 4  ;;  %v735_v37 = vsel %vm314_vm6, %v2331_v35, 0.0 }
 0x2ce   :  { %v736_v40 = vrot.slane %v735_v37, 4 }
 0x2cf   :  { %v617_v39 = vadd.f32 %v616_v36, %v615_v34 }
 0x2d0   :  { %v737_v47 = vadd.f32 %v736_v40, %v735_v37 }
 0x2d1   :  { %v618_v46 = vrot.slane %v617_v39, 2 }
 0x2d2   :  { %v738_v54 = vrot.slane %v737_v47, 2 }
 0x2d3   :  { %v619_v53 = vadd.f32 %v618_v46, %v617_v39 }
 0x2d4   :  { %v739_v59 = vadd.f32 %v738_v54, %v737_v47 }
 0x2d5   :  { %v2333_v38 = vpop.eup %2332  ;;  %v620_v61 = vrot.slane %v619_v53, 1 }
 0x2d6   :  { %v2335_v41 = vpop.eup %2334  ;;  %v325_v42 = vsel %vm314_vm6, %v2333_v38, 0.0  ;;  %v740_v0 = vrot.slane %v739_v59, 1 }
 0x2d7   :  { %v326_v43 = vrot.slane %v325_v42, 4  ;;  %v446_v44 = vsel %vm314_vm6, %v2335_v41, 0.0  ;;  %v621_v63 = vadd.f32 %v620_v61, %v619_v53 }
 0x2d8   :  { %v447_v45 = vrot.slane %v446_v44, 4  ;;  %v741_v1 = vadd.f32 %v740_v0, %v739_v59 }
 0x2d9   :  { %v327_v48 = vadd.f32 %v326_v43, %v325_v42 }
 0x2da   :  { %v448_v50 = vadd.f32 %v447_v45, %v446_v44 }
 0x2db   :  { %v328_v51 = vrot.slane %v327_v48, 2 }
 0x2dc   :  { %v449_v52 = vrot.slane %v448_v50, 2 }
 0x2dd   :  { %v329_v55 = vadd.f32 %v328_v51, %v327_v48 }
 0x2de   :  { %v450_v56 = vadd.f32 %v449_v52, %v448_v50 }
 0x2df   :  { %v330_v57 = vrot.slane %v329_v55, 1 }
 0x2e0   :  { %v451_v58 = vrot.slane %v450_v56, 1 }
 0x2e1   :  { %v331_v60 = vadd.f32 %v330_v57, %v329_v55 }
 0x2e2   :  { %v452_v62 = vadd.f32 %v451_v58, %v450_v56 }
 0x2e3   :  { %2336 = vrcp.f32 %v331_v60 }
 0x2e4   :  { %2338 = vrcp.f32 %v452_v62 }
 0x2e5   :  { %2340 = vrcp.f32 %v621_v63 }
 0x2e6   :  { %2342 = vrcp.f32 %v741_v1 }
 0x2ed   :  { %v2337_v2 = vpop.eup %2336 }
 0x2ee   :  { %v333_v3 = vmul.f32 %v2337_v2, %v2333_v38  ;;  %v2339_v4 = vpop.eup %2338 }
 0x2ef   :  { %v454_v6 = vmul.f32 %v2339_v4, %v2335_v41  ;;  %v2341_v7 = vpop.eup %2340 }
 0x2f0   :  { %2145 = vmatmul.mubr.msk.f32.vlgmr.msra.gmra.mrb[0].mxu0 %vm314_vm6, %v333_v3  ;;  %v623_v8 = vmul.f32 %v2341_v7, %v2329_v33  ;;  %v2343_v9 = vpop.eup %2342  ;;  %v2284_v33 = vpack.c.bf16 %v939_v31, %v938_v28  ;;  %v2025_v31 = vld [vmem:[#allocation10 + $0x50] ss:$0 sm:$0xff] }
 0x2f1   :  { %2148 = vmatpush3.msra.mxu0 %v456_v5  ;;  %2149 = vmatprep.mubr.msk.f32.mxu0 %vm2523_vm2, %v2519_v17  ;;  %v743_v11 = vmul.f32 %v2343_v9, %v2331_v35 }
 0x2f2   :  { %2152 = vmatprep.subr.mxu0 %v2519_v17 }
 0x2f4   :  { %2150 = vmatmul.mubr.msk.f32.vlgmr.msra.gmra.mrb[2].mxu0 %vm314_vm6, %v454_v6 }
 0x2f5   :  { %2153 = vmatpush3.msra.mxu0 %v2616_v19  ;;  %2154 = vmatprep.mubr.msk.f32.mxu0 %vm2523_vm2, %v2519_v17  ;;  %v2264_v19 = vpack.c.bf16 %v848_v13, %v847_v12 }
 0x2f6   :  { %2157 = vmatprep.subr.mxu0 %v2519_v17 }
 0x2f7   :  { %2265 = vmatprep.subr.bf16.mxu1 %v2264_v19 }
 0x2f8   :  { %2155 = vmatmul.mubr.msk.f32.vlgmr.msra.gmra.mrb[4].mxu0 %vm314_vm6, %v623_v8  ;;  %2267 = vmatpush3.bf16.msra.mxu1 %v2264_v19 }
 0x2f9   :  { %2158 = vmatpush3.msra.mxu0 %v745_v10  ;;  %2159 = vmatprep.mubr.msk.f32.mxu0 %vm2523_vm2, %v2519_v17 }
 0x2fa   :  { %2269 = vmatprep.subr.bf16.mxu1 %v2268_v16  ;;  %2273 = vmatprep.subr.bf16.mxu0 %v2272_v22 }
 0x2fc   :  { %2160 = vmatmul.mubr.msk.f32.vlgmr.msra.gmra.mrb[6].mxu0 %vm314_vm6, %v743_v11  ;;  %2271 = vmatpush3.bf16.msra.mxu1 %v2268_v16 }
 0x2fd   :  { %2192 = vmatprep.subr.mxu1 %v2519_v17  ;;  %2275 = vmatpush3.bf16.msra.mxu0 %v2272_v22 }
 0x2fe   :  { %2277 = vmatprep.subr.bf16.mxu0 %v2276_v24 }
 0x301   :  { %2279 = vmatpush3.bf16.msra.mxu0 %v2276_v24 }
 0x302   :  { %2281 = vmatprep.subr.bf16.mxu0 %v2280_v27 }
 0x305   :  { %2283 = vmatpush3.bf16.msra.mxu0 %v2280_v27 }
 0x306   :  { %2285 = vmatprep.subr.bf16.mxu0 %v2284_v33 }
 0x309   :  { %2287 = vmatpush3.bf16.msra.mxu0 %v2284_v33 }
 0x30a   :  { %2207 = vmatprep.subr.mxu0 %v2519_v17 }
 0x3c3   :  { %v403_v34 = vpop.f32.mrb[0].mxu0 }
 0x3c4   :  { %vm407_vm10 = vcmp.gt.f32.partialorder %v403_v34, 0.0  ;;  %v408_v35 = vmul.f32 0.2, %v403_v34  ;;  %v2146_v36 = vpop.f32.mrb[1].mxu0 }
 0x3c6   :  { %v409_v37 = vsel %vm407_vm10, %v403_v34, %v408_v35 }
 0x3c7   :  { %v410_v38 = vmul.f32 %v409_v37, %v409_v37  ;;  %v527_v39 = vpop.f32.mrb[2].mxu0 }
 0x3c8   :  { %vm531_vm12 = vcmp.gt.f32.partialorder %v527_v39, 0.0  ;;  %v532_v40 = vmul.f32 0.2, %v527_v39  ;;  %v2151_v41 = vpop.f32.mrb[3].mxu0 }
 0x3c9   :  { %v412_v42 = vsel %vm411_vm11, %v410_v38, 0.0 }
 0x3ca   :  { %v413_v43 = vrot.slane %v412_v42, 4  ;;  %v533_v44 = vsel %vm531_vm12, %v527_v39, %v532_v40 }
 0x3cb   :  { %v534_v45 = vmul.f32 %v533_v44, %v533_v44  ;;  %v693_v46 = vpop.f32.mrb[4].mxu0 }
 0x3cc   :  { %v414_v47 = vadd.f32 %v413_v43, %v412_v42  ;;  %vm697_vm13 = vcmp.gt.f32.partialorder %v693_v46, 0.0  ;;  %v698_v48 = vmul.f32 0.2, %v693_v46  ;;  %v2156_v50 = vpop.f32.mrb[5].mxu0 }
 0x3cd   :  { %v535_v51 = vsel %vm411_vm11, %v534_v45, 0.0 }
 0x3ce   :  { %v415_v52 = vrot.slane %v414_v47, 2  ;;  %v536_v53 = vrot.slane %v535_v51, 4  ;;  %v699_v54 = vsel %vm697_vm13, %v693_v46, %v698_v48 }
 0x3cf   :  { %v700_v55 = vmul.f32 %v699_v54, %v699_v54  ;;  %v816_v56 = vpop.f32.mrb[6].mxu0 }
 0x3d0   :  { %v416_v57 = vadd.f32 %v415_v52, %v414_v47  ;;  %v537_v58 = vadd.f32 %v536_v53, %v535_v51  ;;  %vm820_vm14 = vcmp.gt.f32.partialorder %v816_v56, 0.0  ;;  %v821_v59 = vmul.f32 0.2, %v816_v56  ;;  %v2161_v60 = vpop.f32.mrb[7].mxu0 }
 0x3d1   :  { %v701_v61 = vsel %vm411_vm11, %v700_v55, 0.0 }
 0x3d2   :  { %v417_v62 = vrot.slane %v416_v57, 1  ;;  %v538_v63 = vrot.slane %v537_v58, 2  ;;  %v702_v0 = vrot.slane %v701_v61, 4  ;;  %v822_v1 = vsel %vm820_vm14, %v816_v56, %v821_v59 }
 0x3d3   :  { %v823_v2 = vmul.f32 %v822_v1, %v822_v1 }
 0x3d4   :  { %v418_v3 = vadd.f32 %v417_v62, %v416_v57  ;;  %v539_v4 = vadd.f32 %v538_v63, %v537_v58  ;;  %v703_v5 = vadd.f32 %v702_v0, %v701_v61 }
 0x3d5   :  { %v824_v6 = vsel %vm411_vm11, %v823_v2, 0.0 }
 0x3d6   :  { %v419_v7 = vmax.f32 %v418_v3, 1e-24  ;;  %v540_v8 = vrot.slane %v539_v4, 1  ;;  %v704_v9 = vrot.slane %v703_v5, 2  ;;  %v825_v10 = vrot.slane %v824_v6, 4 }
 0x3d8   :  { %v541_v11 = vadd.f32 %v540_v8, %v539_v4  ;;  %v705_v12 = vadd.f32 %v704_v9, %v703_v5  ;;  %v826_v13 = vadd.f32 %v825_v10, %v824_v6  ;;  %2344 = vrsqrt.f32 %v419_v7 }
 0x3da   :  { %v542_v19 = vmax.f32 %v541_v11, 1e-24  ;;  %v706_v14 = vrot.slane %v705_v12, 1  ;;  %v827_v15 = vrot.slane %v826_v13, 2 }
 0x3dc   :  { %2346 = vrsqrt.f32 %v542_v19  ;;  %v707_v16 = vadd.f32 %v706_v14, %v705_v12  ;;  %v828_v18 = vadd.f32 %v827_v15, %v826_v13 }
 0x3de   :  { %v708_v20 = vmax.f32 %v707_v16, 1e-24  ;;  %v829_v21 = vrot.slane %v828_v18, 1 }
 0x3e0   :  { %v830_v22 = vadd.f32 %v829_v21, %v828_v18  ;;  %2348 = vrsqrt.f32 %v708_v20 }
 0x3e2   :  { %v831_v23 = vmax.f32 %v830_v22, 1e-24  ;;  %v2345_v24 = vpop.eup %2344 }
 0x3e3   :  { %v421_v26 = vmul.f32 %v2345_v24, %v409_v37 }
 0x3e4   :  { %2350 = vrsqrt.f32 %v831_v23 }
 0x3e6   :  { %v2347_v25 = vpop.eup %2346 }
 0x3e7   :  { %v544_v27 = vmul.f32 %v2347_v25, %v533_v44 }
 0x3e9   :  { %v545_v28 = vadd.f32 %v544_v27, %v421_v26 }
 0x3ea   :  { %v2349_v34 = vpop.eup %2348 }
 0x3eb   :  { %v546_v33 = vmul.f32 0.5, %v545_v28  ;;  %v710_v39 = vmul.f32 %v2349_v34, %v699_v54 }
 0x3ed   :  { %v551_v35 = vadd.f32 %v2025_v31, %v546_v33 }
 0x3ee   :  { %v2351_v36 = vpop.eup %2350 }
 0x3ef   :  { %v553_v38 = vmin.f32 %v551_v35, 0.0  ;;  %v833_v40 = vmul.f32 %v2351_v36, %v822_v1  ;;  %vm552_vm15 = vcmp.gt.f32.partialorder %v551_v35, 0.0 }
 0x3f1   :  { %v554_v41 = vmul.f32 1.442695, %v553_v38  ;;  %v834_v42 = vadd.f32 %v833_v40, %v710_v39 }
 0x3f3   :  { %2352 = vpow2.f32 %v554_v41  ;;  %v835_v43 = vmul.f32 0.5, %v834_v42 }
 0x3f5   :  { %v836_v45 = vadd.f32 %v2025_v31, %v835_v43 }
 0x3f7   :  { %v838_v46 = vmin.f32 %v836_v45, 0.0  ;;  %vm837_vm4 = vcmp.gt.f32.partialorder %v836_v45, 0.0 }
 0x3f9   :  { %v839_v47 = vmul.f32 1.442695, %v838_v46 }
 0x3fb   :  { %2354 = vpow2.f32 %v839_v47 }
 0x3fd   :  { %v2353_v48 = vpop.eup %2352 }
 0x3fe   :  { %v2026_v37 = vadd.f32 -1.0, %v2353_v48 }
 0x400   :  { %v557_v44 = vsel %vm552_vm15, %v551_v35, %v2026_v37 }
 0x401   :  { %558 = vst.msk [vmem:[#allocation2] sm:$0xff] %vm411_vm11, %v557_v44 }
 0x405   :  { %v2355_v50 = vpop.eup %2354 }
 0x406   :  { %v2029_v51 = vadd.f32 -1.0, %v2355_v50 }
 0x408   :  { %v842_v52 = vsel %vm837_vm4, %v836_v45, %v2029_v51  ;;  %v845_v53 = vld [vmem:[#allocation2] sm:$0xff] }
 0x409   :  { %844 = vst.msk [vmem:[#allocation2 + $0x8] sm:$0xff] %vm411_vm11, %v842_v52  ;;  %2170 = vmatprep.mubr.msk.f32.mxu1 %vm411_vm11, %v845_v53 }
 0x410   :  { %v846_v54 = vld [vmem:[#allocation2 + $0x8] sm:$0xff] }
 0x411   :  { %2171 = vmatmul.mubr.msk.f32.vlgmr.msra.gmra.mrb[4].mxu1 %vm411_vm11, %v846_v54 }
 0x412   :  { %2194 = vmatprep.mubr.msk.f32.mxu1 %vm2523_vm2, %v2519_v17 }
 0x4e4   :  { %v2682_v55 = vpop.f32.mrb[4].mxu1 }
 0x4e5   :  { %v923_v56 = vpop.f32.mrb[5].mxu1 }
 0x4e6   :  { %2189 = vmatprep.mubr.msk.f32.mxu0 %vm185_vm1, %v923_v56  ;;  %2193 = vmatpush3.msra.mxu1 %v923_v56 }
 0x4e7   :  { %2190 = vmatmul.mubr.msk.f32.vlgmr.msra.gmra.mrb[8].mxu0 %vm185_vm1, %v2682_v55  ;;  %2197 = vmatprep.subr.mxu1 %v2519_v17 }
 0x4e8   :  { %2209 = vmatprep.mubr.msk.f32.mxu0 %vm2523_vm2, %v2519_v17 }
 0x5ba   :  { %v2191_v57 = vpop.f32.mrb[8].mxu0 }
 0x5bb   :  { %1459 = vperm.xlu0 %2326, %v2191_v57   ;;  %1339 = vperm.xlu1 %2327, %v2191_v57   ;;  %v1012_v58 = vpop.f32.mrb[9].mxu0 }
 0x5bf   :  { %1176 = vperm.xlu0 %2326, %v1012_v58   ;;  %1056 = vperm.xlu1 %2327, %v1012_v58  }
 0x5dd   :  { %1305 = vxpose.xlu0.b32.start.end [1/1] (short) (narrow) %v2191_v57, 8 }
 0x5e8   :  { %1022 = vxpose.xlu1.b32.start.end [1/1] (short) (narrow) %v1012_v58, 8 }
 0x606   :  { %1207 = vrot.lane.b32.xlu0 %v923_v56, %s2522_s4  ;;  %1490 = vrot.lane.b32.xlu1 %v2682_v55, %s2522_s4 }
 0x63a   :  { %v1460_v59 = vpop.permute.xlu0 %1459  ;;  %v1340_v62 = vpop.permute.xlu1 %1339 }
 0x63e   :  { %v1177_v60 = vpop.permute.xlu0 %1176  ;;  %v1057_v5 = vpop.permute.xlu1 %1056 }
 0x65d   :  { %v1321_v61 = vpop.trf.xlu0 }
 0x65e   :  { %v1345_v63 = vrot.slane %v1321_v61, %v2627_v29  ;;  %v1465_v0 = vrot.slane %v1321_v61, %v2629_v30 }
 0x660   :  { %v1346_v1 = vadd.f32 %v1345_v63, %v1340_v62  ;;  %v1466_v2 = vadd.f32 %v1465_v0, %v1460_v59 }
 0x662   :  { %vm1347_vm1 = vcmp.gt.f32.partialorder %v1346_v1, 0.0  ;;  %v1348_v3 = vmul.f32 0.2, %v1346_v1  ;;  %vm1467_vm5 = vcmp.gt.f32.partialorder %v1466_v2, 0.0  ;;  %v1468_v4 = vmul.f32 0.2, %v1466_v2 }
 0x664   :  { %v1349_v6 = vsel %vm1347_vm1, %v1346_v1, %v1348_v3  ;;  %v1469_v7 = vsel %vm1467_vm5, %v1466_v2, %v1468_v4 }
 0x665   :  { %v1350_v8 = vsel %vm92_vm3, %v1349_v6, -9e+15  ;;  %v1470_v9 = vsel %vm92_vm3, %v1469_v7, -9e+15 }
 0x666   :  { %v1351_v10 = vsel %vm314_vm6, %v1350_v8, -inf  ;;  %v1471_v11 = vsel %vm314_vm6, %v1470_v9, -inf }
 0x667   :  { %v1352_v12 = vrot.slane %v1351_v10, 4  ;;  %v1472_v13 = vrot.slane %v1471_v11, 4 }
 0x668   :  { %v1038_v19 = vpop.trf.xlu1 }
 0x669   :  { %v1353_v14 = vmax.f32 %v1351_v10, %v1352_v12  ;;  %v1473_v15 = vmax.f32 %v1471_v11, %v1472_v13  ;;  %v1062_v16 = vrot.slane %v1038_v19, %v2627_v29  ;;  %v1182_v18 = vrot.slane %v1038_v19, %v2629_v30 }
 0x66b   :  { %v1354_v20 = vrot.slane %v1353_v14, 2  ;;  %v1474_v21 = vrot.slane %v1473_v15, 2  ;;  %v1063_v22 = vadd.f32 %v1062_v16, %v1057_v5  ;;  %v1183_v23 = vadd.f32 %v1182_v18, %v1177_v60 }
 0x66d   :  { %v1355_v24 = vmax.f32 %v1353_v14, %v1354_v20  ;;  %v1475_v32 = vmax.f32 %v1473_v15, %v1474_v21  ;;  %vm1064_vm3 = vcmp.gt.f32.partialorder %v1063_v22, 0.0  ;;  %v1065_v25 = vmul.f32 0.2, %v1063_v22 }
 0x66e   :  { %vm1184_vm8 = vcmp.gt.f32.partialorder %v1183_v23, 0.0  ;;  %v1185_v26 = vmul.f32 0.2, %v1183_v23 }
 0x66f   :  { %v1356_v27 = vrot.slane %v1355_v24, 1  ;;  %v1476_v28 = vrot.slane %v1475_v32, 1  ;;  %v1066_v31 = vsel %vm1064_vm3, %v1063_v22, %v1065_v25 }
 0x670   :  { %v1067_v33 = vsel %vm91_vm7, %v1066_v31, -9e+15  ;;  %v1186_v34 = vsel %vm1184_vm8, %v1183_v23, %v1185_v26 }
 0x671   :  { %v1357_v29 = vmax.f32 %v1355_v24, %v1356_v27  ;;  %v1477_v35 = vmax.f32 %v1475_v32, %v1476_v28  ;;  %v1068_v30 = vsel %vm314_vm6, %v1067_v33, -inf  ;;  %v1187_v36 = vsel %vm91_vm7, %v1186_v34, -9e+15 }
 0x672   :  { %v1069_v38 = vrot.slane %v1068_v30, 4  ;;  %v1188_v39 = vsel %vm314_vm6, %v1187_v36, -inf }
 0x673   :  { %v1358_v40 = vsub.f32 %v1350_v8, %v1357_v29  ;;  %v1478_v41 = vsub.f32 %v1470_v9, %v1477_v35  ;;  %v1189_v42 = vrot.slane %v1188_v39, 4 }
 0x674   :  { %v1070_v43 = vmax.f32 %v1068_v30, %v1069_v38 }
 0x675   :  { %v1359_v45 = vmul.f32 1.442695, %v1358_v40  ;;  %v1479_v46 = vmul.f32 1.442695, %v1478_v41  ;;  %v1190_v47 = vmax.f32 %v1188_v39, %v1189_v42  ;;  %v1587_v39 = vld [vmem:[#allocation10 + $0xc0] sm:$0xff]  ;;  %v1588_v40 = vld [vmem:[#allocation10 + $0xc8] sm:$0xff] }
 0x676   :  { %v1071_v48 = vrot.slane %v1070_v43, 2  ;;  %v2288_v41 = vpack.c.bf16 %v1588_v40, %v1587_v39  ;;  %v1589_v42 = vld [vmem:[#allocation10 + $0xd0] sm:$0xff]  ;;  %v2036_v40 = vld [vmem:[#allocation10 + $0xb8] ss:$0 sm:$0xff] }
 0x677   :  { %2356 = vpow2.f32 %v1359_v45  ;;  %v1191_v37 = vrot.slane %v1190_v47, 2 }
 0x678   :  { %2358 = vpow2.f32 %v1479_v46  ;;  %v1072_v44 = vmax.f32 %v1070_v43, %v1071_v48  ;;  %v1491_v50 = vpop.permute.xlu1 %1490  ;;  %v1208_v35 = vpop.permute.xlu0 %1207  ;;  %v1590_v43 = vld [vmem:[#allocation10 + $0xd8] sm:$0xff] }
 0x679   :  { %v1192_v51 = vmax.f32 %v1190_v47, %v1191_v37  ;;  %2208 = vmatpush3.msra.mxu0 %v1491_v50  ;;  %v2292_v45 = vpack.c.bf16 %v1590_v43, %v1589_v42 }
 0x67a   :  { %v1073_v49 = vrot.slane %v1072_v44, 1 }
 0x67b   :  { %v1193_v52 = vrot.slane %v1192_v51, 1 }
 0x67c   :  { %v1074_v53 = vmax.f32 %v1072_v44, %v1073_v49 }
 0x67d   :  { %v1194_v54 = vmax.f32 %v1192_v51, %v1193_v52 }
 0x67e   :  { %v1075_v56 = vsub.f32 %v1067_v33, %v1074_v53 }
 0x67f   :  { %v1195_v57 = vsub.f32 %v1187_v36, %v1194_v54 }
 0x680   :  { %v1076_v58 = vmul.f32 1.442695, %v1075_v56 }
 0x681   :  { %v2357_v59 = vpop.eup %2356  ;;  %v1196_v60 = vmul.f32 1.442695, %v1195_v57 }
 0x682   :  { %v2359_v61 = vpop.eup %2358  ;;  %2360 = vpow2.f32 %v1076_v58  ;;  %v1361_v0 = vsel %vm314_vm6, %v2357_v59, 0.0 }
 0x683   :  { %v1481_v62 = vsel %vm314_vm6, %v2359_v61, 0.0  ;;  %2362 = vpow2.f32 %v1196_v60  ;;  %v1362_v2 = vrot.slane %v1361_v0, 4 }
 0x684   :  { %v1482_v63 = vrot.slane %v1481_v62, 4 }
 0x685   :  { %v1363_v6 = vadd.f32 %v1362_v2, %v1361_v0 }
 0x686   :  { %v1483_v1 = vadd.f32 %v1482_v63, %v1481_v62 }
 0x687   :  { %v1364_v19 = vrot.slane %v1363_v6, 2 }
 0x688   :  { %v1484_v3 = vrot.slane %v1483_v1, 2 }
 0x689   :  { %v1365_v20 = vadd.f32 %v1364_v19, %v1363_v6 }
 0x68a   :  { %v1485_v4 = vadd.f32 %v1484_v3, %v1483_v1 }
 0x68b   :  { %v1366_v25 = vrot.slane %v1365_v20, 1 }
 0x68c   :  { %v2361_v5 = vpop.eup %2360  ;;  %v1486_v7 = vrot.slane %v1485_v4, 1 }
 0x68d   :  { %v2363_v8 = vpop.eup %2362  ;;  %v1078_v9 = vsel %vm314_vm6, %v2361_v5, 0.0  ;;  %v1367_v31 = vadd.f32 %v1366_v25, %v1365_v20 }
 0x68e   :  { %v1079_v10 = vrot.slane %v1078_v9, 4  ;;  %v1198_v11 = vsel %vm314_vm6, %v2363_v8, 0.0  ;;  %v1487_v12 = vadd.f32 %v1486_v7, %v1485_v4 }
 0x68f   :  { %v1199_v13 = vrot.slane %v1198_v11, 4 }
 0x690   :  { %v1080_v14 = vadd.f32 %v1079_v10, %v1078_v9  ;;  %2364 = vrcp.f32 %v1487_v12 }
 0x691   :  { %v1200_v15 = vadd.f32 %v1199_v13, %v1198_v11 }
 0x692   :  { %v1081_v16 = vrot.slane %v1080_v14, 2 }
 0x693   :  { %v1201_v18 = vrot.slane %v1200_v15, 2 }
 0x694   :  { %v1082_v21 = vadd.f32 %v1081_v16, %v1080_v14 }
 0x695   :  { %v1202_v22 = vadd.f32 %v1201_v18, %v1200_v15 }
 0x696   :  { %v1083_v23 = vrot.slane %v1082_v21, 1 }
 0x697   :  { %v1203_v24 = vrot.slane %v1202_v22, 1 }
 0x698   :  { %v1084_v32 = vadd.f32 %v1083_v23, %v1082_v21 }
 0x699   :  { %v1204_v26 = vadd.f32 %v1203_v24, %v1202_v22 }
 0x69a   :  { %v2365_v27 = vpop.eup %2364  ;;  %2366 = vrcp.f32 %v1084_v32 }
 0x69b   :  { %v1489_v28 = vmul.f32 %v2365_v27, %v2359_v61  ;;  %2368 = vrcp.f32 %v1204_v26 }
 0x69c   :  { %2370 = vrcp.f32 %v1367_v31 }
 0x69d   :  { %2210 = vmatmul.mubr.msk.f32.vlgmr.msra.gmra.mrb[10].mxu0 %vm314_vm6, %v1489_v28 }
 0x6a4   :  { %v2367_v33 = vpop.eup %2366 }
 0x6a5   :  { %v1086_v34 = vmul.f32 %v2367_v33, %v2361_v5  ;;  %v2369_v29 = vpop.eup %2368 }
 0x6a6   :  { %v1206_v30 = vmul.f32 %v2369_v29, %v2363_v8  ;;  %v2371_v36 = vpop.eup %2370 }
 0x6a7   :  { %2195 = vmatmul.mubr.msk.f32.vlgmr.msra.gmra.mrb[6].mxu1 %vm314_vm6, %v1086_v34  ;;  %v1369_v38 = vmul.f32 %v2371_v36, %v2357_v59 }
 0x6a8   :  { %2198 = vmatpush3.msra.mxu1 %v1208_v35  ;;  %2199 = vmatprep.mubr.msk.f32.mxu1 %vm2523_vm2, %v2519_v17 }
 0x6a9   :  { %2202 = vmatprep.subr.mxu1 %v2519_v17 }
 0x6ab   :  { %2200 = vmatmul.mubr.msk.f32.vlgmr.msra.gmra.mrb[8].mxu1 %vm314_vm6, %v1206_v30 }
 0x6ac   :  { %2203 = vmatpush3.msra.mxu1 %v2682_v55  ;;  %2204 = vmatprep.mubr.msk.f32.mxu1 %vm2523_vm2, %v2519_v17 }
 0x6ad   :  { %2289 = vmatprep.subr.bf16.mxu1 %v2288_v41 }
 0x6af   :  { %2205 = vmatmul.mubr.msk.f32.vlgmr.msra.gmra.mrb[10].mxu1 %vm314_vm6, %v1369_v38 }
 0x6b0   :  { %2291 = vmatpush3.bf16.msra.mxu1 %v2288_v41 }
 0x6b1   :  { %2293 = vmatprep.subr.bf16.mxu1 %v2292_v45 }
 0x6b4   :  { %2295 = vmatpush3.bf16.msra.mxu1 %v2292_v45 }
 0x770   :  { %v1562_v46 = vpop.f32.mrb[10].mxu0 }
 0x771   :  { %vm1566_vm7 = vcmp.gt.f32.partialorder %v1562_v46, 0.0  ;;  %v1567_v47 = vmul.f32 0.2, %v1562_v46  ;;  %v2211_v55 = vpop.f32.mrb[11].mxu0 }
 0x773   :  { %v2723_v48 = vsel %vm1566_vm7, %v1562_v46, %v1567_v47 }
 0x774   :  { %v1569_v17 = vmul.f32 %v2723_v48, %v2723_v48 }
 0x776   :  { %v1570_v37 = vsel %vm411_vm11, %v1569_v17, 0.0 }
 0x777   :  { %v1571_v44 = vrot.slane %v1570_v37, 4 }
 0x779   :  { %v1572_v52 = vadd.f32 %v1571_v44, %v1570_v37  ;;  %v1683_v44 = vld [vmem:[#allocation10 + $0xe8] sm:$0xff] }
 0x77a   :  { %v1156_v50 = vpop.f32.mrb[6].mxu1 }
 0x77b   :  { %vm1160_vm2 = vcmp.gt.f32.partialorder %v1156_v50, 0.0  ;;  %v1161_v51 = vmul.f32 0.2, %v1156_v50  ;;  %v2196_v49 = vpop.f32.mrb[7].mxu1  ;;  %v1573_v60 = vrot.slane %v1572_v52, 2 }
 0x77d   :  { %v1162_v53 = vsel %vm1160_vm2, %v1156_v50, %v1161_v51  ;;  %v1574_v5 = vadd.f32 %v1573_v60, %v1572_v52  ;;  %v1684_v50 = vld [vmem:[#allocation10 + $0xf0] sm:$0xff] }
 0x77e   :  { %v1163_v54 = vmul.f32 %v1162_v53, %v1162_v53  ;;  %v1279_v56 = vpop.f32.mrb[8].mxu1  ;;  %v2296_v51 = vpack.c.bf16 %v1684_v50, %v1683_v44  ;;  %v1832_v60 = vld [vmem:[#allocation10 + $0x110] sm:$0xff] }
 0x77f   :  { %vm1283_vm6 = vcmp.gt.f32.partialorder %v1279_v56, 0.0  ;;  %v1284_v57 = vmul.f32 0.2, %v1279_v56  ;;  %v2201_v58 = vpop.f32.mrb[9].mxu1  ;;  %v1575_v13 = vrot.slane %v1574_v5, 1 }
 0x780   :  { %v1164_v59 = vsel %vm411_vm11, %v1163_v54, 0.0  ;;  %2297 = vmatprep.subr.bf16.mxu0 %v2296_v51 }
 0x781   :  { %v1165_v61 = vrot.slane %v1164_v59, 4  ;;  %v1285_v62 = vsel %vm1283_vm6, %v1279_v56, %v1284_v57  ;;  %v1576_v21 = vadd.f32 %v1575_v13, %v1574_v5  ;;  %2299 = vmatpush3.bf16.msra.mxu0 %v2296_v51 }
 0x782   :  { %v1286_v63 = vmul.f32 %v1285_v62, %v1285_v62  ;;  %v1439_v0 = vpop.f32.mrb[10].mxu1 }
 0x783   :  { %v1166_v1 = vadd.f32 %v1165_v61, %v1164_v59  ;;  %vm1443_vm9 = vcmp.gt.f32.partialorder %v1439_v0, 0.0  ;;  %v1444_v2 = vmul.f32 0.2, %v1439_v0  ;;  %v2206_v3 = vpop.f32.mrb[11].mxu1  ;;  %v1577_v26 = vmax.f32 %v1576_v21, 1e-24 }
 0x784   :  { %v1287_v4 = vsel %vm411_vm11, %v1286_v63, 0.0  ;;  %v1833_v61 = vld [vmem:[#allocation10 + $0x118] sm:$0xff]  ;;  %v1830_v63 = vld [vmem:[#allocation10 + $0x100] sm:$0xff]  ;;  %v1799_v3 = vstv %s2045_s15 }
 0x785   :  { %v1167_v6 = vrot.slane %v1166_v1, 2  ;;  %v1288_v7 = vrot.slane %v1287_v4, 4  ;;  %v1445_v8 = vsel %vm1443_vm9, %v1439_v0, %v1444_v2  ;;  %v1831_v0 = vld [vmem:[#allocation10 + $0x108] sm:$0xff]  ;;  %v1803_v2 = vstv %s1802_s14 }
 0x786   :  { %v1446_v9 = vmul.f32 %v1445_v8, %v1445_v8  ;;  %v1805_v5 = vmul.f32 %v1803_v2, %v1799_v3 }
 0x787   :  { %v1168_v10 = vadd.f32 %v1167_v6, %v1166_v1  ;;  %v1289_v11 = vadd.f32 %v1288_v7, %v1287_v4  ;;  %v2304_v1 = vpack.c.bf16 %v1831_v0, %v1830_v63  ;;  %v1788_v4 = vstv %s1787_s16 }
 0x788   :  { %v1447_v12 = vsel %vm411_vm11, %v1446_v9, 0.0  ;;  %v1804_v6 = vmul.f32 %v1803_v2, %v1788_v4  ;;  %v1807_v7 = vstv %s2046_s1 }
 0x789   :  { %v1169_v19 = vrot.slane %v1168_v10, 1  ;;  %v1290_v14 = vrot.slane %v1289_v11, 2  ;;  %v1448_v15 = vrot.slane %v1447_v12, 4 }
 0x78a   :  { %v1808_v9 = vadd.f32 %v1807_v7, %v1804_v6 }
 0x78b   :  { %v1170_v16 = vadd.f32 %v1169_v19, %v1168_v10  ;;  %v1291_v18 = vadd.f32 %v1290_v14, %v1289_v11  ;;  %v1449_v20 = vadd.f32 %v1448_v15, %v1447_v12 }
 0x78c   :  { %v1810_v11 = vsub.f32 0.0, %v1808_v9 }
 0x78d   :  { %v1171_v22 = vmax.f32 %v1170_v16, 1e-24  ;;  %v1292_v23 = vrot.slane %v1291_v18, 1  ;;  %v1450_v24 = vrot.slane %v1449_v20, 2 }
 0x78e   :  { %v1812_v13 = vmul.f32 1.442695, %v1810_v11 }
 0x78f   :  { %v1293_v32 = vadd.f32 %v1292_v23, %v1291_v18  ;;  %v1451_v25 = vadd.f32 %v1450_v24, %v1449_v20  ;;  %2372 = vrsqrt.f32 %v1171_v22  ;;  %v2042_v18 = vld [vmem:[#allocation10 + $0xf8] ss:$0 sm:$0xff] }
 0x791   :  { %v1294_v27 = vmax.f32 %v1293_v32, 1e-24  ;;  %v1452_v28 = vrot.slane %v1451_v25, 1 }
 0x793   :  { %2374 = vrsqrt.f32 %v1294_v27  ;;  %v1453_v31 = vadd.f32 %v1452_v28, %v1451_v25 }
 0x794   :  { %2376 = vrsqrt.f32 %v1577_v26 }
 0x795   :  { %v1454_v33 = vmax.f32 %v1453_v31, 1e-24  ;;  %v2388_v31 = vld [vmem:[#allocation4] sm:$0xff] }
 0x797   :  { %2378 = vrsqrt.f32 %v1454_v33 }
 0x799   :  { %v2373_v34 = vpop.eup %2372 }
 0x79a   :  { %v1173_v35 = vmul.f32 %v2373_v34, %v1162_v53 }
 0x79d   :  { %v2375_v29 = vpop.eup %2374 }
 0x79e   :  { %v1296_v30 = vmul.f32 %v2375_v29, %v1285_v62  ;;  %v2377_v36 = vpop.eup %2376  ;;  %v2300_v62 = vpack.c.bf16 %v1833_v61, %v1832_v60  ;;  %v2389_v29 = vld [vmem:[#allocation4 + $0x8] sm:$0xff] }
 0x79f   :  { %v1579_v41 = vmul.f32 %v2377_v36, %v2723_v48  ;;  %v2039_v48 = vld [vmem:[#allocation10 + $0xe0] ss:$0 sm:$0xff] }
 0x7a0   :  { %v1297_v38 = vadd.f32 %v1296_v30, %v1173_v35  ;;  %2301 = vmatprep.subr.bf16.mxu0 %v2300_v62 }
 0x7a1   :  { %v2379_v39 = vpop.eup %2378 }
 0x7a2   :  { %v1298_v42 = vmul.f32 0.5, %v1297_v38  ;;  %v1456_v43 = vmul.f32 %v2379_v39, %v1445_v8  ;;  %v1809_v8 = vadd.f32 %v1807_v7, %v1805_v5 }
 0x7a4   :  { %v1303_v45 = vadd.f32 %v2036_v40, %v1298_v42  ;;  %v1580_v46 = vadd.f32 %v1579_v41, %v1456_v43  ;;  %v1811_v10 = vsub.f32 0.0, %v1809_v8  ;;  %v2051_v41 = vld [vmem:[#allocation10 + $0x120] ss:$0 sm:$0xff] }
 0x7a6   :  { %1304 = vst.msk [vmem:[#allocation3] sm:$0xff] %vm411_vm11, %v1303_v45  ;;  %v1581_v47 = vmul.f32 0.5, %v1580_v46  ;;  %v1814_v12 = vmul.f32 1.442695, %v1811_v10 }
 0x7a8   :  { %v1582_v55 = vadd.f32 %v2036_v40, %v1581_v47  ;;  %2380 = vpow2.f32 %v1814_v12 }
 0x7a9   :  { %2382 = vpow2.f32 %v1812_v13 }
 0x7aa   :  { %1584 = vst.msk [vmem:[#allocation3 + $0x8] sm:$0xff] %vm411_vm11, %v1582_v55 }
 0x7ad   :  { %v1585_v17 = vld [vmem:[#allocation3] sm:$0xff] }
 0x7ae   :  { %2220 = vmatprep.mubr.msk.f32.mxu1 %vm411_vm11, %v1585_v17 }
 0x7b1   :  { %v1586_v37 = vld [vmem:[#allocation3 + $0x8] sm:$0xff] }
 0x7b2   :  { %2221 = vmatmul.mubr.msk.f32.vlgmr.msra.gmra.mrb[12].mxu1 %vm411_vm11, %v1586_v37  ;;  %v2381_v19 = vpop.eup %2380 }
 0x7b3   :  { %v2383_v14 = vpop.eup %2382  ;;  %v1817_v15 = vadd.f32 1.0, %v2381_v19 }
 0x7b4   :  { %v1816_v16 = vadd.f32 1.0, %v2383_v14 }
 0x7b5   :  { %2384 = vrcp.f32 %v1817_v15 }
 0x7b6   :  { %2386 = vrcp.f32 %v1816_v16 }
 0x7bf   :  { %v2385_v20 = vpop.eup %2384 }
 0x7c0   :  { %v2387_v21 = vpop.eup %2386  ;;  %v1823_v32 = vsub.f32 1.0, %v2385_v20  ;;  %v1827_v35 = vmul.f32 %v2389_v29, %v2385_v20 }
 0x7c1   :  { %v1822_v27 = vsub.f32 1.0, %v2387_v21  ;;  %v1826_v33 = vmul.f32 %v2388_v31, %v2387_v21 }
 0x885   :  { %v2222_v49 = vpop.f32.mrb[12].mxu1 }
 0x886   :  { %v1674_v52 = vadd.f32 %v2222_v49, %v2039_v48  ;;  %v1668_v53 = vpop.f32.mrb[13].mxu1 }
 0x887   :  { %v1669_v54 = vadd.f32 %v2039_v48, %v1668_v53 }
 0x888   :  { %v1680_v56 = vmul.f32 0.01, %v1674_v52  ;;  %vm1678_vm10 = vcmp.gt.f32.partialorder %v1674_v52, 0.0 }
 0x889   :  { %vm1677_vm12 = vcmp.gt.f32.partialorder %v1669_v54, 0.0  ;;  %v1679_v57 = vmul.f32 0.01, %v1669_v54 }
 0x88a   :  { %v1682_v59 = vsel %vm1678_vm10, %v1674_v52, %v1680_v56 }
 0x88b   :  { %v1681_v58 = vsel %vm1677_vm12, %v1669_v54, %v1679_v57 }
 0x88c   :  { %2227 = vmatprep.mubr.msk.f32.mxu0 %vm95_vm0, %v1681_v58 }
 0x88d   :  { %2228 = vmatmul.mubr.msk.f32.vlgmr.msra.gmra.mrb[12].mxu0 %vm95_vm0, %v1682_v59 }
 0x88e   :  { %2303 = vmatpush3.bf16.msra.mxu0 %v2300_v62 }
 0x88f   :  { %2305 = vmatprep.subr.bf16.mxu0 %v2304_v1 }
 0x960   :  { %v2229_v22 = vpop.f32.mrb[12].mxu0 }
 0x961   :  { %v1768_v23 = vadd.f32 %v2229_v22, %v2042_v18  ;;  %v1762_v24 = vpop.f32.mrb[13].mxu0 }
 0x962   :  { %v1763_v25 = vadd.f32 %v2042_v18, %v1762_v24 }
 0x963   :  { %vm1772_vm11 = vcmp.gt.f32.partialorder %v1768_v23, 0.0  ;;  %v1774_v26 = vmul.f32 0.01, %v1768_v23 }
 0x964   :  { %vm1771_vm13 = vcmp.gt.f32.partialorder %v1763_v25, 0.0  ;;  %v1773_v28 = vmul.f32 0.01, %v1763_v25 }
 0x965   :  { %v1776_v34 = vsel %vm1772_vm11, %v1768_v23, %v1774_v26 }
 0x966   :  { %v1825_v30 = vmul.f32 %v1823_v32, %v1776_v34  ;;  %v1775_v36 = vsel %vm1771_vm13, %v1763_v25, %v1773_v28 }
 0x967   :  { %v1824_v38 = vmul.f32 %v1822_v27, %v1775_v36 }
 0x968   :  { %v1829_v40 = vadd.f32 %v1827_v35, %v1825_v30 }
 0x969   :  { %v1828_v39 = vadd.f32 %v1826_v33, %v1824_v38 }
 0x96b   :  { %2234 = vmatprep.mubr.msk.f32.mxu0 %vm95_vm0, %v1828_v39 }
 0x96c   :  { %2235 = vmatmul.mubr.msk.f32.vlgmr.msra.gmra.mrb[14].mxu0 %vm95_vm0, %v1829_v40 }
 0x96d   :  { %2307 = vmatpush3.bf16.msra.mxu0 %v2304_v1  ;;  %2241 = vmatprep.mubr.msk.f32.mxu0 %vm95_vm0, %v2388_v31 }
 0x974   :  { %2242 = vmatmul.mubr.msk.f32.vlgmr.msra.gmra.mrb[14].mxu0 %vm95_vm0, %v2389_v29 }
 0xa47   :  { %v2243_v42 = vpop.f32.mrb[14].mxu0 }
 0xa48   :  { %v1996_v43 = vadd.f32 %v2243_v42, %v2051_v41  ;;  %v1981_v45 = vpop.f32.mrb[15].mxu0 }
 0xa49   :  { %v1995_v46 = vadd.f32 %v2051_v41, %v1981_v45 }
 0xa4a   :  { %1998 = vst.msk [vmem:[#allocation14 + $0x8] sm:$0xff] %vm95_vm0, %v1996_v43 }
 0xa4b   :  { %1997 = vst.msk [vmem:[#allocation14] sm:$0xff] %vm95_vm0, %v1995_v46 }
 0xa4c   :  { %2491 = shalt.err (!%p2488_p10)
}
 0xa4d   :  { %s2492_s23 = scalar_lea.hbm %s2764_s5, 256 }
 0xa4e   :  { %p2493_p11 = scmp.ne.s32.totalorder %s2764_s5, %s2492_s23  ;;  %p2496_p12 = scmp.lt.u32.totalorder %s2492_s23, %s2764_s5 }
 0xa50   :  { %p2498_p13 = pnand %p2496_p12, %p2493_p11 }
 0xa52   :  { %2501 = shalt.err (!%p2498_p13)
}
 0xa53   :  { %2010 = dma.vmem_to_hbm [thread:$0]  %s2005_s18, 256, %s2764_s5, [#allocation6], %s2514_s30, %s2514_s30, %s2515_s6  }
 0xa54   :  { %2510 = dma.done.wait [#allocation6], 256  }
 0xa55   :  { %2511 = vsyncadd [#allocation6], 4294967040 }
 0xa56   :  { %2014 = vsyncpa [#allocation5], 1 }
 0xa57   :  { %2015 = vsyncpa [#allocation9], 1 }
 0xa58   :  { %2016 = vsyncpa [#allocation6], 1 }
 0xa59   :  { %2017 = vsyncpa [#allocation7], 1 }
 0xa5a   :  { %2018 = vsyncpa [#allocation13], 1 }

</bundles_post_ra>
